<compile_context>
chip_gen: v7x
topology: tpu7x:2x2x1
jax: 0.10.0
libtpu: 0.0.40
codegen_flags: <defaults>
</compile_context>

<pallas_src>
import math
import numpy as np
import jax
import jax.numpy as jnp
from jax import lax
from jax.experimental import pallas as pl
from jax.experimental.pallas import tpu as pltpu

DIM = 256            # DiffusionNet hidden "dim" (fixed by the module)
HALF_DIM = DIM // 2  # sinusoidal embedding half-dim (128 == one lane row)


# --------------------------------------------------------------------------
# Mish variants
# --------------------------------------------------------------------------
def _mish_exact(x):
    # Used only in the (one-off) wrapper precompute; matches PyTorch nn.Mish.
    return x * jnp.tanh(jax.nn.softplus(x))


def _mish_fast(x):
    # In-kernel Mish: tanh(softplus(x)) == e(e+2)/(e(e+2)+2) with e = exp(x).
    # 1 exp + 1 approx reciprocal (both EUP) instead of exp + log1p + tanh.
    # Clamp before exp to avoid overflow; for x > 20, mish(x) ~= x exactly (f32).
    e = jnp.exp(jnp.minimum(x, 20.0))
    t = e * (e + 2.0)
    return jnp.where(x > 20.0, x, x * (t * pl.reciprocal(t + 2.0, approx=True)))


# --------------------------------------------------------------------------
# Kernel: whole denoising trajectory in one invocation
# --------------------------------------------------------------------------
def denoise_kernel(
    coef_ref,    # SMEM [4*T] f32 : per-step scheduler coefficients (flat)
    h1t_ref,     # VMEM [T, 1024] f32 : time-branch contribution (incl. b1)
    c1_ref,      # VMEM [Bp, 1024] f32 : cond @ W1c (step-invariant)
    init_ref,    # VMEM [Bp, Ap]  f32 : initial gaussian sample x_T
    noise_ref,   # VMEM [T*Bp, Ap] f32 : variance noise, pre-scaled by sqrt(var_t)
    w1x_ref,     # VMEM [Ap, 1024] bf16
    w2_ref,      # VMEM [1024, 512] bf16
    b2_ref,      # VMEM [1, 512] f32
    w3_ref,      # VMEM [512, 256] bf16
    b3_ref,      # VMEM [1, 256] f32
    w4_ref,      # VMEM [256, Ap] bf16
    b4_ref,      # VMEM [1, Ap] f32
    out_ref,     # VMEM [Bp, Ap] f32
):
    num_steps = h1t_ref.shape[0]
    b_pad = init_ref.shape[0]

    def body(step, x):
        x_bf = x.astype(jnp.bfloat16)

        # mlp layer 1: h1t[step] (time branch + b1) + cond@W1c + x@W1x
        h1 = (h1t_ref[pl.ds(step, 1), :]
              + c1_ref[...]
              + jnp.dot(x_bf, w1x_ref[...], preferred_element_type=jnp.float32))
        h1 = _mish_fast(h1)
        h2 = _mish_fast(jnp.dot(h1.astype(jnp.bfloat16), w2_ref[...],
                                preferred_element_type=jnp.float32) + b2_ref[...])
        h3 = _mish_fast(jnp.dot(h2.astype(jnp.bfloat16), w3_ref[...],
                                preferred_element_type=jnp.float32) + b3_ref[...])
        eps = (jnp.dot(h3.astype(jnp.bfloat16), w4_ref[...],
                       preferred_element_type=jnp.float32) + b4_ref[...])  # [Bp, Ap]

        # DDPM step (epsilon prediction, clip_sample=True, fixed_small variance;
        # variance noise already pre-scaled, zero at t==0).
        inv_sqrt_alpha_prod = coef_ref[4 * step + 0]
        sqrt_beta_prod = coef_ref[4 * step + 1]
        pred_orig_coeff = coef_ref[4 * step + 2]
        cur_sample_coeff = coef_ref[4 * step + 3]

        pred_orig = jnp.clip((x - sqrt_beta_prod * eps) * inv_sqrt_alpha_prod,
                             -1.0, 1.0)
        row0 = pl.multiple_of(step * b_pad, b_pad)
        noise = noise_ref[pl.ds(row0, b_pad), :]
        return pred_orig_coeff * pred_orig + cur_sample_coeff * x + noise

    out_ref[...] = lax.fori_loop(0, num_steps, body, init_ref[...])


# --------------------------------------------------------------------------
# DDPM schedule (squaredcos_cap_v2), coefficients in denoise-step order
# --------------------------------------------------------------------------
def _alpha_bar(t):
    return math.cos((t + 0.008) / 1.008 * math.pi / 2) ** 2


def make_schedule(T):
    betas = np.array(
        [min(1.0 - _alpha_bar((i + 1) / T) / _alpha_bar(i / T), 0.999)
         for i in range(T)],
        dtype=np.float64,
    )
    alphas_cumprod = np.cumprod(1.0 - betas)
    coefs = np.zeros((T, 4), np.float32)
    sqrt_var = np.zeros((T,), np.float32)
    for s in range(T):                       # step s handles timestep t = T-1-s
        t = T - 1 - s
        ap_t = alphas_cumprod[t]
        ap_prev = alphas_cumprod[t - 1] if t > 0 else 1.0
        bp_t = 1.0 - ap_t
        bp_prev = 1.0 - ap_prev
        cur_alpha = ap_t / ap_prev
        cur_beta = 1.0 - cur_alpha
        coefs[s, 0] = 1.0 / math.sqrt(ap_t)                 # 1/sqrt(alpha_prod_t)
        coefs[s, 1] = math.sqrt(bp_t)                       # sqrt(1 - alpha_prod_t)
        coefs[s, 2] = math.sqrt(ap_prev) * cur_beta / bp_t  # pred_original coeff
        coefs[s, 3] = math.sqrt(cur_alpha) * bp_prev / bp_t # current sample coeff
        if t > 0:                                           # diffusers skips noise at t==0
            sqrt_var[s] = math.sqrt(max(bp_prev / bp_t * cur_beta, 1e-20))
    return coefs.reshape(-1), sqrt_var


# --------------------------------------------------------------------------
# Parameters (PyTorch shapes, f32)
# --------------------------------------------------------------------------
def init_params(key, state_dim, action_dim):
    scale = 0.02
    ks = jax.random.split(key, 8)
    w = lambda k, s: (scale * jax.random.normal(k, s)).astype(jnp.float32)
    z = lambda s: jnp.zeros(s, jnp.float32)
    return dict(
        # time_mlp: Linear(256, 1024) + Mish + Linear(1024, 256)
        wt1=w(ks[0], (DIM, 4 * DIM)), bt1=z((4 * DIM,)),
        wt2=w(ks[1], (4 * DIM, DIM)), bt2=z((DIM,)),
        # mlp first Linear(256 + state + action, 1024), split [temb | cond | x]
        w1t=w(ks[2], (DIM, 1024)),
        w1c=w(ks[3], (state_dim, 1024)),
        w1x=w(ks[4], (action_dim, 1024)),
        b1=z((1024,)),
        w2=w(ks[5], (1024, 512)), b2=z((512,)),
        w3=w(ks[6], (512, 256)), b3=z((256,)),
        w4=w(ks[7], (256, action_dim)), b4=z((action_dim,)),
    )


def precompute_time_table(params, T):
    """[T,1024] table: full time branch + its W1t projection + b1, exact f32."""
    t = jnp.arange(T - 1, -1, -1, dtype=jnp.float32)                 # T-1 .. 0
    freqs = jnp.exp(jnp.arange(HALF_DIM, dtype=jnp.float32)
                    * -(math.log(10000.0) / (HALF_DIM - 1)))
    arg = t[:, None] * freqs[None, :]                                # [T, 128]
    emb = jnp.concatenate([jnp.sin(arg), jnp.cos(arg)], axis=-1)     # [T, 256]
    h = _mish_exact(emb @ params["wt1"] + params["bt1"])             # [T, 1024]
    temb = h @ params["wt2"] + params["bt2"]                         # [T, 256]
    return temb @ params["w1t"] + params["b1"]                       # [T, 1024]


# --------------------------------------------------------------------------
# Forward: get_actions (sample=True path)
# --------------------------------------------------------------------------
def get_actions(params, state, action_dim, diffusion_iter, key):
    B, state_dim = state.shape
    T = diffusion_iter
    B_pad = max(8, ((B + 7) // 8) * 8)                    # full f32 sublane tiles
    A_pad = max(128, ((action_dim + 127) // 128) * 128)   # lane-dense output

    # ---- step-/batch-invariant precomputes (plain XLA, once per call) ------
    h1t = precompute_time_table(params, T)                            # [T, 1024]
    c1 = jnp.zeros((B_pad, 1024), jnp.float32).at[:B].set(state @ params["w1c"])

    coef_flat, sqrt_var = make_schedule(T)

    key, k0, kn = jax.random.split(key, 3)
    init_action = jax.random.normal(k0, (B, action_dim), jnp.float32)
    step_noise = jax.random.normal(kn, (T, B, action_dim), jnp.float32)
    step_noise = step_noise * jnp.asarray(sqrt_var)[:, None, None]    # pre-scale

    init_p = jnp.zeros((B_pad, A_pad), jnp.float32).at[:B, :action_dim].set(init_action)
    noise_p = (jnp.zeros((T, B_pad, A_pad), jnp.float32)
               .at[:, :B, :action_dim].set(step_noise)
               .reshape(T * B_pad, A_pad))

    # ---- weights: bf16 for the MXU, ragged dims zero-padded ----------------
    w1x = (jnp.zeros((A_pad, 1024), jnp.float32)
           .at[:action_dim].set(params["w1x"]).astype(jnp.bfloat16))
    w2 = params["w2"].astype(jnp.bfloat16)
    b2 = params["b2"].reshape(1, -1)
    w3 = params["w3"].astype(jnp.bfloat16)
    b3 = params["b3"].reshape(1, -1)
    w4 = (jnp.zeros((256, A_pad), jnp.float32)
          .at[:, :action_dim].set(params["w4"]).astype(jnp.bfloat16))
    b4 = jnp.zeros((1, A_pad), jnp.float32).at[:, :action_dim].set(
        params["b4"].reshape(1, -1))

    vmem = pl.BlockSpec(memory_space=pltpu.MemorySpace.VMEM)
    smem = pl.BlockSpec(memory_space=pltpu.MemorySpace.SMEM)

    # Single invocation, no grid: ~1.6 MiB of weights + ~8 KiB/step of tables
    # stay VMEM-resident; fine on v5e/v6e (128 MiB) and v7x (64 MiB) for any
    # realistic diffusion_iter.
    # TODO(synk): for very large padded batches on v7x, add a leading
    # batch-tile grid axis marked "parallel" to use the second TensorCore.
    fn = pl.pallas_call(
        denoise_kernel,
        out_shape=jax.ShapeDtypeStruct((B_pad, A_pad), jnp.float32),
        in_specs=[smem] + [vmem] * 11,
        out_specs=pl.BlockSpec(memory_space=pltpu.MemorySpace.VMEM),
    )
    out = fn(jnp.asarray(coef_flat, jnp.float32), h1t, c1, init_p, noise_p,
             w1x, w2, b2, w3, b3, w4, b4)

    # TODO(synk): add_noise=True branch (state perturbation/rescale) and the
    # energy=True EBM-gradient net are not exercised by the default forward.
    return out[:B, :action_dim]


if __name__ == "__main__":
    B = 2
    state_dim = 16
    action_dim = 4
    diffusion_iter = 4

    key = jax.random.PRNGKey(0)
    k_params, k_state, k_run = jax.random.split(key, 3)

    params = init_params(k_params, state_dim, action_dim)
    state = jax.random.normal(k_state, (B, state_dim), jnp.float32)

    actions = get_actions(params, state, action_dim, diffusion_iter, k_run)
    actions = jax.block_until_ready(actions)
    assert actions.shape == (B, action_dim)
    assert bool(jnp.all(jnp.isfinite(actions)))
    print("KERNEL_OK")
</pallas_src>

<mosaic_0001>
module attributes {stable_mosaic.version = 11 : i64} {
  func.func @denoise_kernel(%arg0: memref<16xf32, #tpu.memory_space<smem>>, %arg1: memref<4x1024xf32, #tpu.memory_space<vmem>>, %arg2: memref<8x1024xf32, #tpu.memory_space<vmem>>, %arg3: memref<8x128xf32, #tpu.memory_space<vmem>>, %arg4: memref<32x128xf32, #tpu.memory_space<vmem>>, %arg5: memref<128x1024xbf16, #tpu.memory_space<vmem>>, %arg6: memref<1024x512xbf16, #tpu.memory_space<vmem>>, %arg7: memref<1x512xf32, #tpu.memory_space<vmem>>, %arg8: memref<512x256xbf16, #tpu.memory_space<vmem>>, %arg9: memref<1x256xf32, #tpu.memory_space<vmem>>, %arg10: memref<256x128xbf16, #tpu.memory_space<vmem>>, %arg11: memref<1x128xf32, #tpu.memory_space<vmem>>, %arg12: memref<8x128xf32, #tpu.memory_space<vmem>>) attributes {dimension_semantics = [], scalar_prefetch = 0 : i64, scratch_operands = 0 : i64, tpu.core_type = #tpu.core_type<tc>} {
    %c0 = arith.constant 0 : index
    %c0_0 = arith.constant 0 : index
    %0 = vector.load %arg3[%c0, %c0_0] : memref<8x128xf32, #tpu.memory_space<vmem>>, vector<8x128xf32>
    %c0_i32 = arith.constant 0 : i32
    %c4_i32 = arith.constant 4 : i32
    %1 = arith.addi %c0_i32, %c4_i32 : i32
    %c1_i32 = arith.constant 1 : i32
    %2 = scf.for %arg13 = %c0_i32 to %1 step %c1_i32 iter_args(%arg14 = %0) -> (vector<8x128xf32>)  : i32 {
      %4 = arith.truncf %arg14 : vector<8x128xf32> to vector<8x128xbf16>
      %5 = arith.index_cast %arg13 : i32 to index
      %c0_4 = arith.constant 0 : index
      %6 = vector.load %arg1[%5, %c0_4] : memref<4x1024xf32, #tpu.memory_space<vmem>>, vector<1x1024xf32>
      %c0_5 = arith.constant 0 : index
      %c0_6 = arith.constant 0 : index
      %7 = vector.load %arg2[%c0_5, %c0_6] : memref<8x1024xf32, #tpu.memory_space<vmem>>, vector<8x1024xf32>
      %8 = vector.broadcast %6 : vector<1x1024xf32> to vector<8x1024xf32>
      %9 = arith.addf %8, %7 : vector<8x1024xf32>
      %c0_7 = arith.constant 0 : index
      %c0_8 = arith.constant 0 : index
      %10 = vector.load %arg5[%c0_7, %c0_8] : memref<128x1024xbf16, #tpu.memory_space<vmem>>, vector<128x1024xbf16>
      %cst = arith.constant dense<0.000000e+00> : vector<8x1024xf32>
      %11 = tpu.matmul %4, %10, %cst {dimension_numbers = #tpu.dot_dimension_numbers<[1], [0], [0], [1], [0, 0, 1, 1], [], []>} : vector<8x128xbf16>, vector<128x1024xbf16>, vector<8x1024xf32> -> vector<8x1024xf32>
      %12 = arith.addf %9, %11 : vector<8x1024xf32>
      %cst_9 = arith.constant 2.000000e+01 : f32
      %13 = vector.broadcast %cst_9 : f32 to vector<8x1024xf32>
      %14 = arith.minimumf %12, %13 : vector<8x1024xf32>
      %15 = math.exp %14 : vector<8x1024xf32>
      %cst_10 = arith.constant 2.000000e+00 : f32
      %16 = vector.broadcast %cst_10 : f32 to vector<8x1024xf32>
      %17 = arith.addf %15, %16 : vector<8x1024xf32>
      %18 = arith.mulf %15, %17 : vector<8x1024xf32>
      %cst_11 = arith.constant 2.000000e+01 : f32
      %19 = vector.broadcast %cst_11 : f32 to vector<8x1024xf32>
      %20 = arith.cmpf ogt, %12, %19 : vector<8x1024xf32>
      %cst_12 = arith.constant 2.000000e+00 : f32
      %21 = vector.broadcast %cst_12 : f32 to vector<8x1024xf32>
      %22 = arith.addf %18, %21 : vector<8x1024xf32>
      %23 = tpu.reciprocal %22 {approx = true} : vector<8x1024xf32> -> vector<8x1024xf32>
      %24 = arith.mulf %18, %23 : vector<8x1024xf32>
      %25 = arith.mulf %12, %24 : vector<8x1024xf32>
      %26 = arith.select %20, %12, %25 : vector<8x1024xi1>, vector<8x1024xf32>
      %27 = arith.truncf %26 : vector<8x1024xf32> to vector<8x1024xbf16>
      %c0_13 = arith.constant 0 : index
      %c0_14 = arith.constant 0 : index
      %28 = vector.load %arg6[%c0_13, %c0_14] : memref<1024x512xbf16, #tpu.memory_space<vmem>>, vector<1024x512xbf16>
      %cst_15 = arith.constant dense<0.000000e+00> : vector<8x512xf32>
      %29 = tpu.matmul %27, %28, %cst_15 {dimension_numbers = #tpu.dot_dimension_numbers<[1], [0], [0], [1], [0, 0, 1, 1], [], []>} : vector<8x1024xbf16>, vector<1024x512xbf16>, vector<8x512xf32> -> vector<8x512xf32>
      %c0_16 = arith.constant 0 : index
      %c0_17 = arith.constant 0 : index
      %30 = vector.load %arg7[%c0_16, %c0_17] : memref<1x512xf32, #tpu.memory_space<vmem>>, vector<1x512xf32>
      %31 = vector.broadcast %30 : vector<1x512xf32> to vector<8x512xf32>
      %32 = arith.addf %29, %31 : vector<8x512xf32>
      %cst_18 = arith.constant 2.000000e+01 : f32
      %33 = vector.broadcast %cst_18 : f32 to vector<8x512xf32>
      %34 = arith.minimumf %32, %33 : vector<8x512xf32>
      %35 = math.exp %34 : vector<8x512xf32>
      %cst_19 = arith.constant 2.000000e+00 : f32
      %36 = vector.broadcast %cst_19 : f32 to vector<8x512xf32>
      %37 = arith.addf %35, %36 : vector<8x512xf32>
      %38 = arith.mulf %35, %37 : vector<8x512xf32>
      %cst_20 = arith.constant 2.000000e+01 : f32
      %39 = vector.broadcast %cst_20 : f32 to vector<8x512xf32>
      %40 = arith.cmpf ogt, %32, %39 : vector<8x512xf32>
      %cst_21 = arith.constant 2.000000e+00 : f32
      %41 = vector.broadcast %cst_21 : f32 to vector<8x512xf32>
      %42 = arith.addf %38, %41 : vector<8x512xf32>
      %43 = tpu.reciprocal %42 {approx = true} : vector<8x512xf32> -> vector<8x512xf32>
      %44 = arith.mulf %38, %43 : vector<8x512xf32>
      %45 = arith.mulf %32, %44 : vector<8x512xf32>
      %46 = arith.select %40, %32, %45 : vector<8x512xi1>, vector<8x512xf32>
      %47 = arith.truncf %46 : vector<8x512xf32> to vector<8x512xbf16>
      %c0_22 = arith.constant 0 : index
      %c0_23 = arith.constant 0 : index
      %48 = vector.load %arg8[%c0_22, %c0_23] : memref<512x256xbf16, #tpu.memory_space<vmem>>, vector<512x256xbf16>
      %cst_24 = arith.constant dense<0.000000e+00> : vector<8x256xf32>
      %49 = tpu.matmul %47, %48, %cst_24 {dimension_numbers = #tpu.dot_dimension_numbers<[1], [0], [0], [1], [0, 0, 1, 1], [], []>} : vector<8x512xbf16>, vector<512x256xbf16>, vector<8x256xf32> -> vector<8x256xf32>
      %c0_25 = arith.constant 0 : index
      %c0_26 = arith.constant 0 : index
      %50 = vector.load %arg9[%c0_25, %c0_26] : memref<1x256xf32, #tpu.memory_space<vmem>>, vector<1x256xf32>
      %51 = vector.broadcast %50 : vector<1x256xf32> to vector<8x256xf32>
      %52 = arith.addf %49, %51 : vector<8x256xf32>
      %cst_27 = arith.constant 2.000000e+01 : f32
      %53 = vector.broadcast %cst_27 : f32 to vector<8x256xf32>
      %54 = arith.minimumf %52, %53 : vector<8x256xf32>
      %55 = math.exp %54 : vector<8x256xf32>
      %cst_28 = arith.constant 2.000000e+00 : f32
      %56 = vector.broadcast %cst_28 : f32 to vector<8x256xf32>
      %57 = arith.addf %55, %56 : vector<8x256xf32>
      %58 = arith.mulf %55, %57 : vector<8x256xf32>
      %cst_29 = arith.constant 2.000000e+01 : f32
      %59 = vector.broadcast %cst_29 : f32 to vector<8x256xf32>
      %60 = arith.cmpf ogt, %52, %59 : vector<8x256xf32>
      %cst_30 = arith.constant 2.000000e+00 : f32
      %61 = vector.broadcast %cst_30 : f32 to vector<8x256xf32>
      %62 = arith.addf %58, %61 : vector<8x256xf32>
      %63 = tpu.reciprocal %62 {approx = true} : vector<8x256xf32> -> vector<8x256xf32>
      %64 = arith.mulf %58, %63 : vector<8x256xf32>
      %65 = arith.mulf %52, %64 : vector<8x256xf32>
      %66 = arith.select %60, %52, %65 : vector<8x256xi1>, vector<8x256xf32>
      %67 = arith.truncf %66 : vector<8x256xf32> to vector<8x256xbf16>
      %c0_31 = arith.constant 0 : index
      %c0_32 = arith.constant 0 : index
      %68 = vector.load %arg10[%c0_31, %c0_32] : memref<256x128xbf16, #tpu.memory_space<vmem>>, vector<256x128xbf16>
      %cst_33 = arith.constant dense<0.000000e+00> : vector<8x128xf32>
      %69 = tpu.matmul %67, %68, %cst_33 {dimension_numbers = #tpu.dot_dimension_numbers<[1], [0], [0], [1], [0, 0, 1, 1], [], []>} : vector<8x256xbf16>, vector<256x128xbf16>, vector<8x128xf32> -> vector<8x128xf32>
      %c0_34 = arith.constant 0 : index
      %c0_35 = arith.constant 0 : index
      %70 = vector.load %arg11[%c0_34, %c0_35] : memref<1x128xf32, #tpu.memory_space<vmem>>, vector<1x128xf32>
      %71 = vector.broadcast %70 : vector<1x128xf32> to vector<8x128xf32>
      %72 = arith.addf %69, %71 : vector<8x128xf32>
      %c4_i32_36 = arith.constant 4 : i32
      %73 = arith.muli %c4_i32_36, %arg13 : i32
      %c0_i32_37 = arith.constant 0 : i32
      %74 = arith.addi %73, %c0_i32_37 : i32
      %75 = arith.index_cast %74 : i32 to index
      %76 = memref.load %arg0[%75] : memref<16xf32, #tpu.memory_space<smem>>
      %c4_i32_38 = arith.constant 4 : i32
      %77 = arith.muli %c4_i32_38, %arg13 : i32
      %c1_i32_39 = arith.constant 1 : i32
      %78 = arith.addi %77, %c1_i32_39 : i32
      %79 = arith.index_cast %78 : i32 to index
      %80 = memref.load %arg0[%79] : memref<16xf32, #tpu.memory_space<smem>>
      %c4_i32_40 = arith.constant 4 : i32
      %81 = arith.muli %c4_i32_40, %arg13 : i32
      %c2_i32 = arith.constant 2 : i32
      %82 = arith.addi %81, %c2_i32 : i32
      %83 = arith.index_cast %82 : i32 to index
      %84 = memref.load %arg0[%83] : memref<16xf32, #tpu.memory_space<smem>>
      %c4_i32_41 = arith.constant 4 : i32
      %85 = arith.muli %c4_i32_41, %arg13 : i32
      %c3_i32 = arith.constant 3 : i32
      %86 = arith.addi %85, %c3_i32 : i32
      %87 = arith.index_cast %86 : i32 to index
      %88 = memref.load %arg0[%87] : memref<16xf32, #tpu.memory_space<smem>>
      %89 = vector.broadcast %80 : f32 to vector<8x128xf32>
      %90 = arith.mulf %89, %72 : vector<8x128xf32>
      %91 = arith.subf %arg14, %90 : vector<8x128xf32>
      %92 = vector.broadcast %76 : f32 to vector<8x128xf32>
      %93 = arith.mulf %91, %92 : vector<8x128xf32>
      %cst_42 = arith.constant -1.000000e+00 : f32
      %cst_43 = arith.constant 1.000000e+00 : f32
      %94 = vector.broadcast %cst_42 : f32 to vector<8x128xf32>
      %95 = arith.maximumf %94, %93 : vector<8x128xf32>
      %96 = vector.broadcast %cst_43 : f32 to vector<8x128xf32>
      %97 = arith.minimumf %96, %95 : vector<8x128xf32>
      %c8_i32 = arith.constant 8 : i32
      %98 = arith.muli %arg13, %c8_i32 : i32
      %99 = tpu.assume_multiple %98, 8 : i32
      %100 = arith.index_cast %99 : i32 to index
      %c0_44 = arith.constant 0 : index
      %101 = vector.load %arg4[%100, %c0_44] : memref<32x128xf32, #tpu.memory_space<vmem>>, vector<8x128xf32>
      %102 = vector.broadcast %84 : f32 to vector<8x128xf32>
      %103 = arith.mulf %102, %97 : vector<8x128xf32>
      %104 = vector.broadcast %88 : f32 to vector<8x128xf32>
      %105 = arith.mulf %104, %arg14 : vector<8x128xf32>
      %106 = arith.addf %103, %105 : vector<8x128xf32>
      %107 = arith.addf %106, %101 : vector<8x128xf32>
      scf.yield %107 : vector<8x128xf32>
    }
    %c4_i32_1 = arith.constant 4 : i32
    %c0_2 = arith.constant 0 : index
    %c0_3 = arith.constant 0 : index
    %3 = vector.load %arg12[%c0_2, %c0_3] : memref<8x128xf32, #tpu.memory_space<vmem>>, vector<8x128xf32>
    tpu.vector_store %arg12[%c0_2, %c0_3], %2 {strides = array<i32>} : memref<8x128xf32, #tpu.memory_space<vmem>>, vector<8x128xf32>,
    return
  }
}

</mosaic_0001>

<bundles_post_ra>
// kernel: tpu_custom_call.1
= control target key start
LH: loop header
LB: loop body
LE: loop exit
PB: predicated region body
PF: predicated region fallthrough
CT: control target
= control target key end

     0   :  { %17 = vsyncpa [#allocation5], 0  ;;  %s5141_s0 = inlined_call_operand.hbm [shape: f32[16], index: 0, kind: input, shape index: {}]   ;;  %s5142_s1 = inlined_call_operand.hbm [shape: f32[4,1024], index: 1, kind: input, shape index: {}]   ;;  %s5143_s2 = inlined_call_operand.hbm [shape: f32[8,1024], index: 2, kind: input, shape index: {}]   ;;  %s5144_s3 = inlined_call_operand.vmem [shape: f32[8,128], index: 3, kind: input, shape index: {}]   ;;  %s5145_s4 = inlined_call_operand.hbm [shape: f32[32,128], index: 4, kind: input, shape index: {}]   ;;  %s5146_s5 = inlined_call_operand.hbm [shape: bf16[128,1024], index: 5, kind: input, shape index: {}]   ;;  %s5147_s6 = inlined_call_operand.hbm [shape: bf16[1024,512], index: 6, kind: input, shape index: {}]   ;;  %s5148_s7 = inlined_call_operand.vmem [shape: f32[1,512], index: 7, kind: input, shape index: {}]   ;;  %s5149_s8 = inlined_call_operand.hbm [shape: bf16[512,256], index: 8, kind: input, shape index: {}]   ;;  %s5150_s9 = inlined_call_operand.vmem [shape: f32[1,256], index: 9, kind: input, shape index: {}]   ;;  %s5151_s10 = inlined_call_operand.hbm [shape: bf16[256,128], index: 10, kind: input, shape index: {}]   ;;  %s5152_s11 = inlined_call_operand.vmem [shape: f32[1,128], index: 11, kind: input, shape index: {}]   ;;  %s5153_s12 = inlined_call_operand.hbm [shape: f32[8,128], index: 12, kind: output, shape index: {}]  }
   0x1   :  { %18 = vsyncpa [#allocation3], 0 }
   0x2   :  { %19 = vsyncpa [#allocation8], 0 }
   0x3   :  { %20 = vsyncpa [#allocation11], 0 }
   0x4   :  { %21 = vsyncpa [#allocation14], 0 }
   0x5   :  { %22 = vsyncpa [#allocation4], 0  ;;  %s4803_s21 = smov [#allocation7]   ;;  %s4804_s23 = smov [#allocation10]  }
   0x6   :  { %s47_s22 = sshll.u32 %s4803_s21, 4  ;;  %s70_s24 = sshll.u32 %s4804_s23, 4  ;;  %s48_s22 = int_to_ptr.vmem [resolvable:$true] %s47_s22  ;;  %s4886_s24 = int_to_ptr.vmem [resolvable:$true] %s70_s24 }
   0x7   :  { %s4589_s27 = scalar_lea.hbm %s5143_s2, 1024 }
   0x8   :  { %p4590_p0 = scmp.ne.s32.totalorder %s5143_s2, %s4589_s27  ;;  %p4593_p1 = scmp.lt.u32.totalorder %s4589_s27, %s5143_s2 }
   0xa   :  { %p4595_p2 = pnand %p4593_p1, %p4590_p0 }
   0xc   :  { %4598 = shalt.err (!%p4595_p2)
}
   0xd   :  { %s4599_s14 = scalar_lea.vmem %s48_s22, 1024  ;;  %p4604_p4 = scmp.lt.s32.totalorder %s48_s22, %s48_s22 }
   0xe   :  { %p4600_p3 = scmp.ne.s32.totalorder %s48_s22, %s4599_s14  ;;  %p4605_p5 = scmp.lt.s32.totalorder %s4599_s14, %s4599_s14 }
  0x10   :  { %p4606_p6 = por %p4605_p5, %p4604_p4 }
  0x12   :  { %p4607_p7 = pnand %p4606_p6, %p4600_p3 }
  0x14   :  { %4610 = shalt.err (!%p4607_p7)
}
  0x15   :  { %50 = dma.hbm_to_vmem [thread:$0]  %s5143_s2, 1024, %s48_s22, [#allocation8]  }
  0x16   :  { %s4611_s19 = scalar_lea.hbm %s5146_s5, 8192 }
  0x17   :  { %p4612_p8 = scmp.ne.s32.totalorder %s5146_s5, %s4611_s19  ;;  %p4615_p9 = scmp.lt.u32.totalorder %s4611_s19, %s5146_s5 }
  0x19   :  { %p4617_p10 = pnand %p4615_p9, %p4612_p8 }
  0x1b   :  { %4620 = shalt.err (!%p4617_p10)
}
  0x1c   :  { %s4621_s26 = scalar_lea.vmem %s4886_s24, 8192  ;;  %p4626_p12 = scmp.lt.s32.totalorder %s4886_s24, %s4886_s24 }
  0x1d   :  { %p4622_p11 = scmp.ne.s32.totalorder %s4886_s24, %s4621_s26  ;;  %p4627_p13 = scmp.lt.s32.totalorder %s4621_s26, %s4621_s26 }
  0x1f   :  { %p4628_p0 = por %p4627_p13, %p4626_p12 }
  0x21   :  { %p4629_p1 = pnand %p4628_p0, %p4622_p11 }
  0x23   :  { %4632 = shalt.err (!%p4629_p1)
}
  0x24   :  { %s4805_s2 = smov 512   ;;  %s4806_s22 = smov 32  }
  0x25   :  { %76 = dma.hbm_to_vmem [thread:$0]  %s5146_s5, 8192, %s4886_s24, [#allocation11], %s4805_s2, %s4805_s2, %s4806_s22  }
  0x26   :  { %s4807_s29 = smov [#allocation13]   ;;  %s4808_s13 = smov [#allocation6]  }
  0x27   :  { %s96_s30 = sshll.u32 %s4807_s29, 4  ;;  %s37_s14 = sshll.u32 %s4808_s13, 4  ;;  %s97_s30 = int_to_ptr.vmem [resolvable:$true] %s96_s30  ;;  %s38_s14 = int_to_ptr.vmem [resolvable:$true] %s37_s14 }
  0x28   :  { %s4633_s17 = scalar_lea.hbm %s5149_s8, 8192 }
  0x29   :  { %p4634_p2 = scmp.ne.s32.totalorder %s5149_s8, %s4633_s17  ;;  %p4637_p3 = scmp.lt.u32.totalorder %s4633_s17, %s5149_s8 }
  0x2b   :  { %p4639_p4 = pnand %p4637_p3, %p4634_p2 }
  0x2d   :  { %4642 = shalt.err (!%p4639_p4)
}
  0x2e   :  { %s4643_s5 = scalar_lea.vmem %s97_s30, 8192  ;;  %p4648_p6 = scmp.lt.s32.totalorder %s97_s30, %s97_s30 }
  0x2f   :  { %p4644_p5 = scmp.ne.s32.totalorder %s97_s30, %s4643_s5  ;;  %p4649_p7 = scmp.lt.s32.totalorder %s4643_s5, %s4643_s5 }
  0x31   :  { %p4650_p8 = por %p4649_p7, %p4648_p6 }
  0x33   :  { %p4651_p9 = pnand %p4650_p8, %p4644_p5 }
  0x35   :  { %4654 = shalt.err (!%p4651_p9)
}
  0x36   :  { %s4809_s24 = smov 128   ;;  %s4810_s23 = smov 8  }
  0x37   :  { %102 = dma.hbm_to_vmem [thread:$0]  %s5149_s8, 8192, %s97_s30, [#allocation14], %s4809_s24, %s4809_s24, %s4810_s23  }
  0x38   :  { %s4655_s27 = scalar_lea.hbm %s5141_s0, 16 }
  0x39   :  { %p4656_p10 = scmp.ne.s32.totalorder %s5141_s0, %s4655_s27  ;;  %p4659_p11 = scmp.lt.u32.totalorder %s4655_s27, %s5141_s0 }
  0x3b   :  { %p4661_p12 = pnand %p4659_p11, %p4656_p10 }
  0x3d   :  { %4664 = shalt.err (!%p4661_p12)
}
  0x3e   :  { %s4811_s16 = smov [#allocation2]   ;;  %s4665_s19 = scalar_lea.hbm %s5142_s1, 512 }
  0x3f   :  { %30 = dma.hbm_to_smem %s5141_s0, 16, %s4811_s16, [#allocation5]  }
  0x40   :  { %p4666_p13 = scmp.ne.s32.totalorder %s5142_s1, %s4665_s19  ;;  %p4669_p0 = scmp.lt.u32.totalorder %s4665_s19, %s5142_s1 }
  0x42   :  { %p4671_p1 = pnand %p4669_p0, %p4666_p13 }
  0x44   :  { %4674 = shalt.err (!%p4671_p1)
}
  0x45   :  { %s4675_s26 = scalar_lea.vmem %s38_s14, 512  ;;  %p4680_p3 = scmp.lt.s32.totalorder %s38_s14, %s38_s14 }
  0x46   :  { %p4676_p2 = scmp.ne.s32.totalorder %s38_s14, %s4675_s26  ;;  %p4681_p4 = scmp.lt.s32.totalorder %s4675_s26, %s4675_s26 }
  0x48   :  { %p4682_p5 = por %p4681_p4, %p4680_p3 }
  0x4a   :  { %p4683_p6 = pnand %p4682_p5, %p4676_p2 }
  0x4c   :  { %4686 = shalt.err (!%p4683_p6)
}
  0x4d   :  { %40 = dma.hbm_to_vmem [thread:$0]  %s5142_s1, 512, %s38_s14, [#allocation3]  }
  0x4e   :  { %s4812_s22 = smov [#allocation9]   ;;  %s4813_s28 = smov [#allocation12]  }
  0x4f   :  { %s58_s27 = sshll.u32 %s4812_s22, 4  ;;  %s82_s29 = sshll.u32 %s4813_s28, 4  ;;  %s59_s27 = int_to_ptr.vmem [resolvable:$true] %s58_s27  ;;  %s83_s29 = int_to_ptr.vmem [resolvable:$true] %s82_s29 }
  0x50   :  { %s4687_s16 = scalar_lea.hbm %s5145_s4, 512 }
  0x51   :  { %p4688_p7 = scmp.ne.s32.totalorder %s5145_s4, %s4687_s16  ;;  %p4691_p8 = scmp.lt.u32.totalorder %s4687_s16, %s5145_s4 }
  0x53   :  { %p4693_p9 = pnand %p4691_p8, %p4688_p7 }
  0x55   :  { %4696 = shalt.err (!%p4693_p9)
}
  0x56   :  { %s4697_s1 = scalar_lea.vmem %s59_s27, 512  ;;  %p4702_p11 = scmp.lt.s32.totalorder %s59_s27, %s59_s27 }
  0x57   :  { %p4698_p10 = scmp.ne.s32.totalorder %s59_s27, %s4697_s1  ;;  %p4703_p12 = scmp.lt.s32.totalorder %s4697_s1, %s4697_s1 }
  0x59   :  { %p4704_p13 = por %p4703_p12, %p4702_p11 }
  0x5b   :  { %p4705_p0 = pnand %p4704_p13, %p4698_p10 }
  0x5d   :  { %4708 = shalt.err (!%p4705_p0)
}
  0x5e   :  { %64 = dma.hbm_to_vmem [thread:$0]  %s5145_s4, 512, %s59_s27, [#allocation8], %s4809_s24, %s4809_s24, %s4810_s23  }
  0x5f   :  { %s4709_s5 = scalar_lea.hbm %s5147_s6, 32768 }
  0x60   :  { %p4710_p1 = scmp.ne.s32.totalorder %s5147_s6, %s4709_s5  ;;  %p4713_p2 = scmp.lt.u32.totalorder %s4709_s5, %s5147_s6 }
  0x62   :  { %p4715_p3 = pnand %p4713_p2, %p4710_p1 }
  0x64   :  { %4718 = shalt.err (!%p4715_p3)
}
  0x65   :  { %s4719_s22 = scalar_lea.vmem %s83_s29, 32768  ;;  %p4724_p5 = scmp.lt.s32.totalorder %s83_s29, %s83_s29 }
  0x66   :  { %p4720_p4 = scmp.ne.s32.totalorder %s83_s29, %s4719_s22  ;;  %p4725_p6 = scmp.lt.s32.totalorder %s4719_s22, %s4719_s22 }
  0x68   :  { %p4726_p7 = por %p4725_p6, %p4724_p5 }
  0x6a   :  { %p4727_p8 = pnand %p4726_p7, %p4720_p4 }
  0x6c   :  { %4730 = shalt.err (!%p4727_p8)
}
  0x6d   :  { %s4814_s4 = smov 256   ;;  %s4815_s24 = smov 16  }
  0x6e   :  { %88 = dma.hbm_to_vmem [thread:$0]  %s5147_s6, 32768, %s83_s29, [#allocation11], %s4814_s4, %s4814_s4, %s4815_s24  }
  0x6f   :  { %s4816_s28 = smov [#allocation15]   ;;  %s4731_s17 = scalar_lea.hbm %s5151_s10, 2048 }
  0x70   :  { %s110_s13 = sshll.u32 %s4816_s28, 4  ;;  %p4732_p9 = scmp.ne.s32.totalorder %s5151_s10, %s4731_s17  ;;  %s111_s13 = int_to_ptr.vmem [resolvable:$true] %s110_s13 }
  0x71   :  { %p4735_p10 = scmp.lt.u32.totalorder %s4731_s17, %s5151_s10 }
  0x73   :  { %p4737_p11 = pnand %p4735_p10, %p4732_p9 }
  0x75   :  { %4740 = shalt.err (!%p4737_p11)
}
  0x76   :  { %s4741_s14 = scalar_lea.vmem %s111_s13, 2048  ;;  %p4746_p13 = scmp.lt.s32.totalorder %s111_s13, %s111_s13 }
  0x77   :  { %p4742_p12 = scmp.ne.s32.totalorder %s111_s13, %s4741_s14  ;;  %p4747_p0 = scmp.lt.s32.totalorder %s4741_s14, %s4741_s14 }
  0x79   :  { %p4748_p1 = por %p4747_p0, %p4746_p13 }
  0x7b   :  { %p4749_p2 = pnand %p4748_p1, %p4742_p12 }
  0x7d   :  { %4752 = shalt.err (!%p4749_p2)
}
  0x7e   :  { %s4817_s6 = smov 64   ;;  %s4818_s29 = smov 4  }
  0x7f   :  { %116 = dma.hbm_to_vmem [thread:$0]  %s5151_s10, 2048, %s111_s13, [#allocation14], %s4817_s6, %s4817_s6, %s4818_s29  }
  0x80   :  { %4783 = dma.done.wait [#allocation5], 16  }
  0x81   :  { %4784 = vsyncadd [#allocation5], 4294967280 }
  0x82   :  { %4785 = dma.done.wait [#allocation3], 512  }
  0x83   :  { %4786 = vsyncadd [#allocation3], 4294966784 }
  0x84   :  { %4787 = dma.done.wait [#allocation8], 1536  }
  0x85   :  { %4788 = vsyncadd [#allocation8], 4294965760 }
  0x86   :  { %4789 = dma.done.wait [#allocation11], 40960  }
  0x87   :  { %4790 = vsyncadd [#allocation11], 4294926336 }
  0x88   :  { %4791 = dma.done.wait [#allocation14], 10240  }
  0x89   :  { %4792 = vsyncadd [#allocation14], 4294957056 }
  0x8a   :  { %143 = sfence }
  0x8b   :  { %v145_v0 = vld [vmem:[%s5144_s3] sm:$0xff]   ;;  %s5000_s25 = smov 0  }
  0x8c LB: > { %v220_v1 = vld [vmem:[#allocation10] sm:$0xff]  ;;  %v4819_v7 = vmov 0   ;;  %v222_v19 = vld [vmem:[#allocation10 + $0x10] sm:$0xff]  ;;  %v221_v54 = vld [vmem:[#allocation10 + $0x8] sm:$0xff]  ;;  %s154_s3 = sshra.s32 %s4801_s25, 2  ;;  %s157_s10 = sand.u32 3, %s4801_s25  ;;  %s4801_s25 = sphi %s5000_s25, %s151_s25   ;;  %v4797_v0 = vphi %v145_v0, %v5154_v0  }
  0x8d   : > { %v224_v2 = vld [vmem:[#allocation10 + $0x20] sm:$0xff]  ;;  %636 = vmatprep.mubr.bf16.mxu1 %v4819_v7  ;;  %718 = vmatprep.mubr.bf16.mxu0 %v4819_v7  ;;  %v226_v20 = vld [vmem:[#allocation10 + $0x30] sm:$0xff]  ;;  %v225_v55 = vld [vmem:[#allocation10 + $0x28] sm:$0xff]  ;;  %s3946_s26 = sshll.u32 %s154_s3, 5  ;;  %s3943_s27 = sshll.u32 %s4801_s25, 2 }
  0x8e   : > { %v228_v3 = vld [vmem:[#allocation10 + $0x40] sm:$0xff]  ;;  %v3543_v4 = vcombine.high %v220_v1, %v224_v2  ;;  %v3542_v5 = vcombine.low %v220_v1, %v224_v2  ;;  %v230_v21 = vld [vmem:[#allocation10 + $0x50] sm:$0xff]  ;;  %v3547_v24 = vcombine.high %v222_v19, %v226_v20  ;;  %v3546_v25 = vcombine.low %v222_v19, %v226_v20  ;;  %v229_v58 = vld [vmem:[#allocation10 + $0x48] sm:$0xff]  ;;  %s160_s0 = sadd.s32 %s3946_s26, %s157_s10  ;;  %s3485_s28 = sadd.s32 1, %s3943_s27 }
  0x8f   : > { %v232_v6 = vld [vmem:[#allocation10 + $0x60] sm:$0xff]  ;;  %v234_v22 = vld [vmem:[#allocation10 + $0x70] sm:$0xff]  ;;  %v3545_v60 = vcombine.high %v221_v54, %v225_v55  ;;  %v233_v61 = vld [vmem:[#allocation10 + $0x68] sm:$0xff]  ;;  %v5012_v1 = vpack.c.bf16 %v4797_v0, %v4797_v0  ;;  %s161_s2 = scalar_lea.vmem [#allocation6], %s160_s0  ;;  %s3486_s13 = sld [smem:[#allocation2 + %s3485_s28]] }
  0x90   : > { %v3551_v8 = vcombine.high %v228_v3, %v232_v6  ;;  %v236_v9 = vld [vmem:[#allocation10 + $0x80] sm:$0xff]  ;;  %604 = vmatprep.subr.bf16.mxu1 %v3543_v4  ;;  %v3550_v11 = vcombine.low %v228_v3, %v232_v6  ;;  %v3555_v26 = vcombine.high %v230_v21, %v234_v22  ;;  %v238_v28 = vld [vmem:[#allocation10 + $0x90] sm:$0xff]  ;;  %686 = vmatprep.subr.bf16.mxu0 %v3547_v24  ;;  %v253_v20 = vld [vmem:[#allocation10 + $0x108] sm:$0xff]  ;;  %s3489_s15 = sadd.s32 3, %s3943_s27  ;;  %s3484_s16 = sld [smem:[#allocation2 + %s3943_s27]] }
  0x91   : > { %v240_v10 = vld [vmem:[#allocation10 + $0xa0] sm:$0xff]  ;;  %605 = vmatpush1.bf16.msra.mxu1 %v3542_v5  ;;  %v242_v29 = vld [vmem:[#allocation10 + $0xb0] sm:$0xff]  ;;  %687 = vmatpush1.bf16.msra.mxu0 %v3546_v25  ;;  %v3554_v32 = vcombine.low %v230_v21, %v234_v22  ;;  %v3544_v3 = vcombine.low %v221_v54, %v225_v55  ;;  %v3553_v5 = vcombine.high %v229_v58, %v233_v61  ;;  %v257_v21 = vld [vmem:[#allocation10 + $0x128] sm:$0xff]  ;;  %s3487_s17 = sadd.s32 2, %s3943_s27  ;;  %s3490_s30 = sld [smem:[#allocation2 + %s3489_s15]] }
  0x92   : > { %606 = vmatprep.subr.bf16.mxu1 %v3551_v8  ;;  %v3559_v12 = vcombine.high %v236_v9, %v240_v10  ;;  %v244_v13 = vld [vmem:[#allocation10 + $0xc0] sm:$0xff]  ;;  %v3558_v15 = vcombine.low %v236_v9, %v240_v10  ;;  %688 = vmatprep.subr.bf16.mxu0 %v3555_v26  ;;  %v3563_v34 = vcombine.high %v238_v28, %v242_v29  ;;  %v246_v36 = vld [vmem:[#allocation10 + $0xd0] sm:$0xff]  ;;  %v237_v9 = vld [vmem:[#allocation10 + $0x88] sm:$0xff]  ;;  %s3488_s1 = sld [smem:[#allocation2 + %s3487_s17]]  ;;  %s3945_s14 = sshll.u32 %s4801_s25, 3 }
  0x93   : > { %v248_v14 = vld [vmem:[#allocation10 + $0xe0] sm:$0xff]  ;;  %v250_v37 = vld [vmem:[#allocation10 + $0xf0] sm:$0xff]  ;;  %v3562_v40 = vcombine.low %v238_v28, %v242_v29  ;;  %v241_v10 = vld [vmem:[#allocation10 + $0xa8] sm:$0xff]  ;;  %v3577_v28 = vcombine.high %v253_v20, %v257_v21  ;;  %s3499_s6 = scalar_lea.vmem [#allocation9], %s3945_s14  ;;  %s151_s25 = sadd.s32 1, %s4801_s25  }
  0x94   : > { %v3567_v16 = vcombine.high %v244_v13, %v248_v14  ;;  %v252_v17 = vld [vmem:[#allocation10 + $0x100] sm:$0xff]  ;;  %v3566_v23 = vcombine.low %v244_v13, %v248_v14  ;;  %v3571_v42 = vcombine.high %v246_v36, %v250_v37  ;;  %v254_v43 = vld [vmem:[#allocation10 + $0x110] sm:$0xff]  ;;  %v3570_v48 = vcombine.low %v246_v36, %v250_v37  ;;  %v261_v26 = vld [vmem:[#allocation10 + $0x148] sm:$0xff]  ;;  %p148_p3 = scmp.ge.s32.totalorder %s151_s25, 4  }
  0x95   : > { %607 = vmatpush1.bf16.msra.mxu1 %v3550_v11  ;;  %v256_v18 = vld [vmem:[#allocation10 + $0x120] sm:$0xff]  ;;  %689 = vmatpush1.bf16.msra.mxu0 %v3554_v32  ;;  %v258_v45 = vld [vmem:[#allocation10 + $0x130] sm:$0xff]  ;;  %v3561_v14 = vcombine.high %v237_v9, %v241_v10  ;;  %v3560_v19 = vcombine.low %v237_v9, %v241_v10  ;;  %v269_v32 = vld [vmem:[#allocation10 + $0x188] sm:$0xff]  ;;  %s4820_s29 = smov (%p148_p3), [#allocation16]  }
  0x96   : > { %608 = vmatprep.subr.bf16.mxu1 %v3559_v12  ;;  %v3575_v27 = vcombine.high %v252_v17, %v256_v18  ;;  %v260_v30 = vld [vmem:[#allocation10 + $0x140] sm:$0xff]  ;;  %v3574_v33 = vcombine.low %v252_v17, %v256_v18  ;;  %690 = vmatprep.subr.bf16.mxu0 %v3563_v34  ;;  %v3579_v50 = vcombine.high %v254_v43, %v258_v45  ;;  %v262_v51 = vld [vmem:[#allocation10 + $0x150] sm:$0xff]  ;;  %v239_v55 = vld [vmem:[#allocation10 + $0x98] sm:$0xff]  ;;  %s3514_s19 = sshll.u32 (%p148_p3), %s4820_s29, 4  ;;  %s3515_s19 = int_to_ptr.vmem [resolvable:$true] %s3514_s19 }
  0x97   : > { %v264_v31 = vld [vmem:[#allocation10 + $0x160] sm:$0xff]  ;;  %v266_v53 = vld [vmem:[#allocation10 + $0x170] sm:$0xff]  ;;  %v3578_v56 = vcombine.low %v254_v43, %v258_v45  ;;  %v3552_v12 = vcombine.low %v229_v58, %v233_v61  ;;  %v227_v45 = vld [vmem:[#allocation10 + $0x38] sm:$0xff]  ;;  %s4753_s20 = scalar_lea.vmem (%p148_p3), %s3515_s19, 128  ;;  %p4758_p5 = scmp.lt.s32.totalorder (%p148_p3), %s3515_s19, %s3515_s19 }
  0x98   : > { %v3583_v35 = vcombine.high %v260_v30, %v264_v31  ;;  %v268_v38 = vld [vmem:[#allocation10 + $0x180] sm:$0xff]  ;;  %v3582_v41 = vcombine.low %v260_v30, %v264_v31  ;;  %v3587_v59 = vcombine.high %v262_v51, %v266_v53  ;;  %v270_v62 = vld [vmem:[#allocation10 + $0x190] sm:$0xff]  ;;  %v3586_v2 = vcombine.low %v262_v51, %v266_v53  ;;  %v235_v51 = vld [vmem:[#allocation10 + $0x78] sm:$0xff]  ;;  %p4754_p4 = scmp.ne.s32.totalorder (%p148_p3), %s3515_s19, %s4753_s20  ;;  %p4759_p6 = scmp.lt.s32.totalorder (%p148_p3), %s4753_s20, %s4753_s20 }
  0x99   : > { %609 = vmatpush1.bf16.msra.mxu1 %v3558_v15  ;;  %v272_v39 = vld [vmem:[#allocation10 + $0x1a0] sm:$0xff]  ;;  %691 = vmatpush1.bf16.msra.mxu0 %v3562_v40  ;;  %v274_v63 = vld [vmem:[#allocation10 + $0x1b0] sm:$0xff]  ;;  %v245_v15 = vld [vmem:[#allocation10 + $0xc8] sm:$0xff]  ;;  %v3576_v31 = vcombine.low %v253_v20, %v257_v21 }
  0x9a   : > { %610 = vmatprep.subr.bf16.mxu1 %v3567_v16  ;;  %v3591_v44 = vcombine.high %v268_v38, %v272_v39  ;;  %v276_v46 = vld [vmem:[#allocation10 + $0x1c0] sm:$0xff]  ;;  %v3590_v49 = vcombine.low %v268_v38, %v272_v39  ;;  %692 = vmatprep.subr.bf16.mxu0 %v3571_v42  ;;  %v278_v4 = vld [vmem:[#allocation10 + $0x1d0] sm:$0xff]  ;;  %v3595_v6 = vcombine.high %v270_v62, %v274_v63  ;;  %v249_v16 = vld [vmem:[#allocation10 + $0xe8] sm:$0xff]  ;;  %p4760_p7 = por (%p148_p3), %p4759_p6, %p4758_p5 }
  0x9b   : > { %v280_v47 = vld [vmem:[#allocation10 + $0x1e0] sm:$0xff]  ;;  %v282_v8 = vld [vmem:[#allocation10 + $0x1f0] sm:$0xff]  ;;  %v3594_v11 = vcombine.low %v270_v62, %v274_v63  ;;  %v3569_v22 = vcombine.high %v245_v15, %v249_v16  ;;  %v3568_v25 = vcombine.low %v245_v15, %v249_v16  ;;  %v277_v38 = vld [vmem:[#allocation10 + $0x1c8] sm:$0xff] }
  0x9c   : > { %v3599_v52 = vcombine.high %v276_v46, %v280_v47  ;;  %v3598_v57 = vcombine.low %v276_v46, %v280_v47  ;;  %v3603_v13 = vcombine.high %v278_v4, %v282_v8  ;;  %v4039_v17 = vld [vmem:[#allocation12 + $0x4] ss:$16 sps:$4 sm:$0xff]   ;;  %v3602_v18 = vcombine.low %v278_v4, %v282_v8  ;;  %v4043_v29 = vld [vmem:[#allocation12 + $0x20] ss:$16 sps:$4 sm:$0xff]   ;;  %v281_v39 = vld [vmem:[#allocation10 + $0x1e8] sm:$0xff]  ;;  %p4761_p8 = pnand (%p148_p3), %p4760_p7, %p4754_p4 }
  0x9d   : > { %611 = vmatpush1.bf16.msra.mxu1 %v3566_v23  ;;  %693 = vmatpush1.bf16.msra.mxu0 %v3570_v48  ;;  %v4037_v23 = vld [vmem:[#allocation12] ss:$16 sps:$4 sm:$0xff]   ;;  %v4045_v24 = vld [vmem:[#allocation12 + $0x24] ss:$16 sps:$4 sm:$0xff]   ;;  %v3601_v46 = vcombine.high %v277_v38, %v281_v39  ;;  %v255_v63 = vld [vmem:[#allocation10 + $0x118] sm:$0xff] }
  0x9e   : > { %612 = vmatprep.subr.bf16.mxu1 %v3575_v27  ;;  %694 = vmatprep.subr.bf16.mxu0 %v3579_v50  ;;  %v265_v27 = vld [vmem:[#allocation10 + $0x168] sm:$0xff]  ;;  %v4051_v30 = vld [vmem:[#allocation12 + $0x44] ss:$16 sps:$4 sm:$0xff]   ;;  %v4061_v47 = vld [vmem:[#allocation12 + $0x80] ss:$16 sps:$4 sm:$0xff]  }
  0x9f   : > { %v3585_v34 = vcombine.high %v261_v26, %v265_v27  ;;  %v4057_v36 = vld [vmem:[#allocation12 + $0x64] ss:$16 sps:$4 sm:$0xff]   ;;  %v3584_v37 = vcombine.low %v261_v26, %v265_v27  ;;  %v231_v50 = vld [vmem:[#allocation10 + $0x58] sm:$0xff]  ;;  %v4067_v53 = vld [vmem:[#allocation12 + $0xa0] ss:$16 sps:$4 sm:$0xff]  }
  0xa0   : > { %v4063_v42 = vld [vmem:[#allocation12 + $0x84] ss:$16 sps:$4 sm:$0xff]   ;;  %v3556_v58 = vcombine.low %v231_v50, %v235_v51  ;;  %v271_v10 = vld [vmem:[#allocation10 + $0x198] sm:$0xff] }
  0xa1   : > { %613 = vmatpush1.bf16.msra.mxu1 %v3574_v33  ;;  %695 = vmatpush1.bf16.msra.mxu0 %v3578_v56  ;;  %v273_v33 = vld [vmem:[#allocation10 + $0x1a8] sm:$0xff]  ;;  %v4069_v48 = vld [vmem:[#allocation12 + $0xa4] ss:$16 sps:$4 sm:$0xff]   ;;  %v243_v56 = vld [vmem:[#allocation10 + $0xb8] sm:$0xff] }
  0xa2   : > { %614 = vmatprep.subr.bf16.mxu1 %v3583_v35  ;;  %696 = vmatprep.subr.bf16.mxu0 %v3587_v59  ;;  %v4049_v35 = vld [vmem:[#allocation12 + $0x40] ss:$16 sps:$4 sm:$0xff]   ;;  %v3593_v40 = vcombine.high %v269_v32, %v273_v33  ;;  %v3592_v43 = vcombine.low %v269_v32, %v273_v33  ;;  %v247_v59 = vld [vmem:[#allocation10 + $0xd8] sm:$0xff]  ;;  %v3565_v61 = vcombine.high %v239_v55, %v243_v56 }
  0xa3   : > { %v3564_v62 = vcombine.low %v239_v55, %v243_v56  ;;  %v4040_v20 = vld [vmem:[#allocation12 + $0x8] ss:$16 sps:$4 sm:$0xff]   ;;  %v4048_v21 = vld [vmem:[#allocation12 + $0x2c] ss:$16 sps:$4 sm:$0xff]   ;;  %v4073_v32 = vld [vmem:[#allocation12 + $0xc0] ss:$16 sps:$4 sm:$0xff]  }
  0xa4   : > { %v4058_v26 = vld [vmem:[#allocation12 + $0x68] ss:$16 sps:$4 sm:$0xff]   ;;  %v4066_v27 = vld [vmem:[#allocation12 + $0x8c] ss:$16 sps:$4 sm:$0xff]   ;;  %v4109_v56 = vld [vmem:[#allocation12 + $0x180] ss:$16 sps:$4 sm:$0xff]  }
  0xa5   : > { %615 = vmatpush1.bf16.msra.mxu1 %v3582_v41  ;;  %697 = vmatpush1.bf16.msra.mxu0 %v3586_v2  ;;  %v4055_v41 = vld [vmem:[#allocation12 + $0x60] ss:$16 sps:$4 sm:$0xff]   ;;  %v259_v2 = vld [vmem:[#allocation10 + $0x138] sm:$0xff] }
  0xa6   : > { %616 = vmatprep.subr.bf16.mxu1 %v3591_v44  ;;  %698 = vmatprep.subr.bf16.mxu0 %v3595_v6  ;;  %v223_v44 = vld [vmem:[#allocation10 + $0x18] sm:$0xff]  ;;  %v3581_v8 = vcombine.high %v255_v63, %v259_v2  ;;  %v3580_v9 = vcombine.low %v255_v63, %v259_v2  ;;  %v4121_v2 = vld [vmem:[#allocation12 + $0x1c0] ss:$16 sps:$4 sm:$0xff]  }
  0xa7   : > { %v3548_v54 = vcombine.low %v223_v44, %v227_v45  ;;  %v267_v6 = vld [vmem:[#allocation10 + $0x178] sm:$0xff] }
  0xa8   : > { %v4076_v33 = vld [vmem:[#allocation12 + $0xc8] ss:$16 sps:$4 sm:$0xff]   ;;  %v4114_v55 = vld [vmem:[#allocation12 + $0x18c] ss:$16 sps:$4 sm:$0xff]  }
  0xa9   : > { %617 = vmatpush1.bf16.msra.mxu1 %v3590_v49  ;;  %699 = vmatpush1.bf16.msra.mxu0 %v3594_v11  ;;  %v3600_v49 = vcombine.low %v277_v38, %v281_v39  ;;  %v275_v11 = vld [vmem:[#allocation10 + $0x1b8] sm:$0xff]  ;;  %v4087_v38 = vld [vmem:[#allocation12 + $0x104] ss:$16 sps:$4 sm:$0xff]  }
  0xaa   : > { %618 = vmatprep.subr.bf16.mxu1 %v3599_v52  ;;  %700 = vmatprep.subr.bf16.mxu0 %v3603_v13  ;;  %v3549_v52 = vcombine.high %v223_v44, %v227_v45  ;;  %v279_v13 = vld [vmem:[#allocation10 + $0x1d8] sm:$0xff]  ;;  %v3597_v15 = vcombine.high %v271_v10, %v275_v11  ;;  %v3596_v16 = vcombine.low %v271_v10, %v275_v11  ;;  %v4091_v44 = vld [vmem:[#allocation12 + $0x120] ss:$16 sps:$4 sm:$0xff]   ;;  %v172_v11 = vlaneseq }
  0xab   : > { %v4090_v39 = vld [vmem:[#allocation12 + $0x10c] ss:$16 sps:$4 sm:$0xff]   ;;  %v4094_v45 = vld [vmem:[#allocation12 + $0x128] ss:$16 sps:$4 sm:$0xff]  }
  0xac   : > { %v4126_v63 = vld [vmem:[#allocation12 + $0x1cc] ss:$16 sps:$4 sm:$0xff]  }
  0xad   : > { %619 = vmatpush1.bf16.msra.mxu1 %v3598_v57  ;;  %701 = vmatpush1.bf16.msra.mxu0 %v3602_v18  ;;  %v3557_v57 = vcombine.high %v231_v50, %v235_v51  ;;  %v4042_v18 = vld [vmem:[#allocation12 + $0xc] ss:$16 sps:$4 sm:$0xff]   ;;  %v4105_v50 = vld [vmem:[#allocation12 + $0x164] ss:$16 sps:$4 sm:$0xff]  }
  0xae   : > { %645 = vmatprep.subr.bf16.mxu1 %v3545_v60  ;;  %2430 = vmatprep.subr.bf16.mxu0 %v4039_v17  ;;  %v251_v60 = vld [vmem:[#allocation10 + $0xf8] sm:$0xff] }
  0xaf   : > { %v3572_v4 = vcombine.low %v247_v59, %v251_v60  ;;  %v4108_v51 = vld [vmem:[#allocation12 + $0x16c] ss:$16 sps:$4 sm:$0xff]  }
  0xb0   : > { %637 = vmatmul.mubr.bf16.vlgmr.msra.gmra.mrb[0].mxu1 %v5012_v1  ;;  %719 = vmatmul.mubr.bf16.vlgmr.msra.gmra.mrb[0].mxu0 %v5012_v1  ;;  %v4138_v10 = vld [vmem:[#allocation12 + $0x20c] ss:$16 sps:$4 sm:$0xff]  }
  0xb1   : > { %646 = vmatpush1.bf16.msra.mxu1 %v3544_v3  ;;  %677 = vmatprep.mubr.bf16.mxu1 %v4819_v7  ;;  %v3573_v3 = vcombine.high %v247_v59, %v251_v60  ;;  %v4120_v59 = vld [vmem:[#allocation12 + $0x1ac] ss:$16 sps:$4 sm:$0xff]   ;;  %v4115_v60 = vld [vmem:[#allocation12 + $0x1a0] ss:$16 sps:$4 sm:$0xff]  }
  0xb2   : > { %647 = vmatprep.subr.bf16.mxu1 %v3553_v5  ;;  %2431 = vmatpush1.bf16.msra.mxu0 %v4037_v23  ;;  %v263_v5 = vld [vmem:[#allocation10 + $0x158] sm:$0xff] }
  0xb3   : > { %2432 = vmatprep.subr.bf16.mxu0 %v4045_v24  ;;  %v4054_v23 = vld [vmem:[#allocation12 + $0x4c] ss:$16 sps:$4 sm:$0xff]   ;;  %v4052_v24 = vld [vmem:[#allocation12 + $0x48] ss:$16 sps:$4 sm:$0xff]  }
  0xb5   : > { %648 = vmatpush1.bf16.msra.mxu1 %v3552_v12  ;;  %v3588_v12 = vcombine.low %v263_v5, %v267_v6 }
  0xb6   : > { %649 = vmatprep.subr.bf16.mxu1 %v3561_v14  ;;  %2433 = vmatpush1.bf16.msra.mxu0 %v4043_v29  ;;  %v283_v14 = vld [vmem:[#allocation10 + $0x1f8] sm:$0xff] }
  0xb7   : > { %2434 = vmatprep.subr.bf16.mxu0 %v4051_v30  ;;  %v3605_v17 = vcombine.high %v279_v13, %v283_v14  ;;  %v4072_v29 = vld [vmem:[#allocation12 + $0xac] ss:$16 sps:$4 sm:$0xff]   ;;  %v4070_v30 = vld [vmem:[#allocation12 + $0xa8] ss:$16 sps:$4 sm:$0xff]  }
  0xb9   : > { %650 = vmatpush1.bf16.msra.mxu1 %v3560_v19  ;;  %v3604_v19 = vcombine.low %v279_v13, %v283_v14  ;;  %v5027_v13 = vld [vmem:[%s161_s2] ss:$4 sm:$0xff] }
  0xba   : > { %651 = vmatprep.subr.bf16.mxu1 %v3569_v22  ;;  %2435 = vmatpush1.bf16.msra.mxu0 %v4049_v35  ;;  %v4046_v22 = vld [vmem:[#allocation12 + $0x28] ss:$16 sps:$4 sm:$0xff]   ;;  %v4084_v35 = vld [vmem:[#allocation12 + $0xec] ss:$16 sps:$4 sm:$0xff]  }
  0xbb   : > { %2436 = vmatprep.subr.bf16.mxu0 %v4057_v36  ;;  %v4079_v36 = vld [vmem:[#allocation12 + $0xe0] ss:$16 sps:$4 sm:$0xff]  }
  0xbd   : > { %652 = vmatpush1.bf16.msra.mxu1 %v3568_v25  ;;  %v4060_v25 = vld [vmem:[#allocation12 + $0x6c] ss:$16 sps:$4 sm:$0xff]  }
  0xbe   : > { %653 = vmatprep.subr.bf16.mxu1 %v3577_v28  ;;  %2437 = vmatpush1.bf16.msra.mxu0 %v4055_v41  ;;  %v4064_v28 = vld [vmem:[#allocation12 + $0x88] ss:$16 sps:$4 sm:$0xff]  }
  0xbf   : > { %2438 = vmatprep.subr.bf16.mxu0 %v4063_v42  ;;  %v4088_v41 = vld [vmem:[#allocation12 + $0x108] ss:$16 sps:$4 sm:$0xff]   ;;  %v4093_v42 = vld [vmem:[#allocation12 + $0x124] ss:$16 sps:$4 sm:$0xff]  }
  0xc1   : > { %654 = vmatpush1.bf16.msra.mxu1 %v3576_v31  ;;  %v4075_v31 = vld [vmem:[#allocation12 + $0xc4] ss:$16 sps:$4 sm:$0xff]  }
  0xc2   : > { %655 = vmatprep.subr.bf16.mxu1 %v3585_v34  ;;  %2439 = vmatpush1.bf16.msra.mxu0 %v4061_v47  ;;  %v4081_v34 = vld [vmem:[#allocation12 + $0xe4] ss:$16 sps:$4 sm:$0xff]   ;;  %v4102_v47 = vld [vmem:[#allocation12 + $0x14c] ss:$16 sps:$4 sm:$0xff]  }
  0xc3   : > { %2440 = vmatprep.subr.bf16.mxu0 %v4069_v48  ;;  %v4097_v48 = vld [vmem:[#allocation12 + $0x140] ss:$16 sps:$4 sm:$0xff]  }
  0xc5   : > { %656 = vmatpush1.bf16.msra.mxu1 %v3584_v37  ;;  %v4082_v37 = vld [vmem:[#allocation12 + $0xe8] ss:$16 sps:$4 sm:$0xff]  }
  0xc6   : > { %657 = vmatprep.subr.bf16.mxu1 %v3593_v40  ;;  %2441 = vmatpush1.bf16.msra.mxu0 %v4067_v53  ;;  %v4085_v40 = vld [vmem:[#allocation12 + $0x100] ss:$16 sps:$4 sm:$0xff]   ;;  %v4106_v53 = vld [vmem:[#allocation12 + $0x168] ss:$16 sps:$4 sm:$0xff]  }
  0xc7   : > { %2442 = vmatprep.subr.bf16.mxu0 %v4075_v31 }
  0xc9   : > { %658 = vmatpush1.bf16.msra.mxu1 %v3592_v43  ;;  %v4096_v43 = vld [vmem:[#allocation12 + $0x12c] ss:$16 sps:$4 sm:$0xff]  }
  0xca   : > { %659 = vmatprep.subr.bf16.mxu1 %v3601_v46  ;;  %2443 = vmatpush1.bf16.msra.mxu0 %v4073_v32  ;;  %v4099_v46 = vld [vmem:[#allocation12 + $0x144] ss:$16 sps:$4 sm:$0xff]  }
  0xcb   : > { %2444 = vmatprep.subr.bf16.mxu0 %v4081_v34 }
  0xcd   : > { %660 = vmatpush1.bf16.msra.mxu1 %v3600_v49  ;;  %v4100_v49 = vld [vmem:[#allocation12 + $0x148] ss:$16 sps:$4 sm:$0xff]  }
  0xce   : > { %727 = vmatprep.subr.bf16.mxu1 %v3549_v52  ;;  %2445 = vmatpush1.bf16.msra.mxu0 %v4079_v36  ;;  %v4103_v52 = vld [vmem:[#allocation12 + $0x160] ss:$16 sps:$4 sm:$0xff]  }
  0xcf   : > { %2446 = vmatprep.subr.bf16.mxu0 %v4087_v38 }
  0xd0   : > { %678 = vmatmul.mubr.bf16.vlgmr.msra.gmra.mrb[4].mxu1 %v5012_v1 }
  0xd1   : > { %728 = vmatpush1.bf16.msra.mxu1 %v3548_v54  ;;  %759 = vmatprep.mubr.bf16.mxu1 %v4819_v7  ;;  %v3589_v7 = vcombine.high %v263_v5, %v267_v6  ;;  %v4111_v54 = vld [vmem:[#allocation12 + $0x184] ss:$16 sps:$4 sm:$0xff]   ;;  %v4132_v5 = vld [vmem:[#allocation12 + $0x1ec] ss:$16 sps:$4 sm:$0xff]   ;;  %v4127_v6 = vld [vmem:[#allocation12 + $0x1e0] ss:$16 sps:$4 sm:$0xff]  }
  0xd2   : > { %729 = vmatprep.subr.bf16.mxu1 %v3557_v57  ;;  %2447 = vmatpush1.bf16.msra.mxu0 %v4085_v40  ;;  %v4112_v57 = vld [vmem:[#allocation12 + $0x188] ss:$16 sps:$4 sm:$0xff]  }
  0xd3   : > { %2448 = vmatprep.subr.bf16.mxu0 %v4093_v42 }
  0xd5   : > { %730 = vmatpush1.bf16.msra.mxu1 %v3556_v58  ;;  %v4117_v58 = vld [vmem:[#allocation12 + $0x1a4] ss:$16 sps:$4 sm:$0xff]  }
  0xd6   : > { %731 = vmatprep.subr.bf16.mxu1 %v3565_v61  ;;  %2449 = vmatpush1.bf16.msra.mxu0 %v4091_v44  ;;  %v4118_v61 = vld [vmem:[#allocation12 + $0x1a8] ss:$16 sps:$4 sm:$0xff]  }
  0xd7   : > { %2450 = vmatprep.subr.bf16.mxu0 %v4099_v46  ;;  %v166_v44 = vld [vmem:[#allocation7 + $0x18] sm:$0xff] }
  0xd9   : > { %732 = vmatpush1.bf16.msra.mxu1 %v3564_v62  ;;  %v4123_v62 = vld [vmem:[#allocation12 + $0x1c4] ss:$16 sps:$4 sm:$0xff]  }
  0xda   : > { %733 = vmatprep.subr.bf16.mxu1 %v3573_v3  ;;  %2451 = vmatpush1.bf16.msra.mxu0 %v4097_v48  ;;  %v4124_v3 = vld [vmem:[#allocation12 + $0x1c8] ss:$16 sps:$4 sm:$0xff]  }
  0xdb   : > { %2452 = vmatprep.subr.bf16.mxu0 %v4105_v50 }
  0xdd   : > { %734 = vmatpush1.bf16.msra.mxu1 %v3572_v4  ;;  %v4129_v4 = vld [vmem:[#allocation12 + $0x1e4] ss:$16 sps:$4 sm:$0xff]  }
  0xde   : > { %735 = vmatprep.subr.bf16.mxu1 %v3581_v8  ;;  %2453 = vmatpush1.bf16.msra.mxu0 %v4103_v52  ;;  %v4130_v8 = vld [vmem:[#allocation12 + $0x1e8] ss:$16 sps:$4 sm:$0xff]  }
  0xdf   : > { %2454 = vmatprep.subr.bf16.mxu0 %v4111_v54 }
  0xe1   : > { %736 = vmatpush1.bf16.msra.mxu1 %v3580_v9  ;;  %v4135_v9 = vld [vmem:[#allocation12 + $0x204] ss:$16 sps:$4 sm:$0xff]  }
  0xe2   : > { %737 = vmatprep.subr.bf16.mxu1 %v3589_v7  ;;  %2455 = vmatpush1.bf16.msra.mxu0 %v4109_v56  ;;  %v5022_v7 = vshrl.u32 %v172_v11, 7  ;;  %v4141_v11 = vld [vmem:[#allocation12 + $0x224] ss:$16 sps:$4 sm:$0xff]  }
  0xe3   : > { %2456 = vmatprep.subr.bf16.mxu0 %v4117_v58 }
  0xe4   : > { %v5030_v14 = vsub.s32 1, %v5022_v7  ;;  %v182_v46 = vsub.s32 2, %v5022_v7  ;;  %v194_v52 = vsub.s32 5, %v5022_v7 }
  0xe5   : > { %738 = vmatpush1.bf16.msra.mxu1 %v3588_v12  ;;  %v5025_v12 = vsub.s32 0, %v5022_v7 }
  0xe6   : > { %739 = vmatprep.subr.bf16.mxu1 %v3597_v15  ;;  %2457 = vmatpush1.bf16.msra.mxu0 %v4115_v60  ;;  %v165_v60 = vld [vmem:[#allocation7 + $0x10] sm:$0xff] }
  0xe7   : > { %2458 = vmatprep.subr.bf16.mxu0 %v4123_v62  ;;  %v175_v15 = vrot.slane %v5027_v13, %v5025_v12 }
  0xe9   : > { %740 = vmatpush1.bf16.msra.mxu1 %v3596_v16  ;;  %v163_v16 = vld [vmem:[#allocation7] sm:$0xff] }
  0xea   : > { %741 = vmatprep.subr.bf16.mxu1 %v3605_v17  ;;  %2459 = vmatpush1.bf16.msra.mxu0 %v4121_v2  ;;  %v179_v17 = vrot.slane %v5027_v13, %v5030_v14 }
  0xeb   : > { %2460 = vmatprep.subr.bf16.mxu0 %v4129_v4 }
  0xed   : > { %742 = vmatpush1.bf16.msra.mxu1 %v3604_v19  ;;  %v212_v19 = vadd.f32 %v175_v15, %v163_v16  ;;  %v4144_v15 = vld [vmem:[#allocation12 + $0x22c] ss:$16 sps:$4 sm:$0xff]  }
  0xee   : > { %2594 = vmatprep.subr.bf16.mxu1 %v4042_v18  ;;  %2461 = vmatpush1.bf16.msra.mxu0 %v4127_v6  ;;  %v164_v18 = vld [vmem:[#allocation7 + $0x8] sm:$0xff] }
  0xef   : > { %2471 = vmatprep.subr.bf16.mxu0 %v4135_v9  ;;  %v4136_v9 = vld [vmem:[#allocation12 + $0x208] ss:$16 sps:$4 sm:$0xff]  }
  0xf0   : > { %760 = vmatmul.mubr.bf16.vlgmr.msra.gmra.mrb[8].mxu1 %v5012_v1  ;;  %v4078_v1 = vld [vmem:[#allocation12 + $0xcc] ss:$16 sps:$4 sm:$0xff]  }
  0xf1   : > { %2595 = vmatpush1.bf16.msra.mxu1 %v4040_v20  ;;  %v213_v20 = vadd.f32 %v179_v17, %v164_v18  ;;  %v4139_v18 = vld [vmem:[#allocation12 + $0x220] ss:$16 sps:$4 sm:$0xff]  }
  0xf2   : > { %2596 = vmatprep.subr.bf16.mxu1 %v4048_v21 }
  0xf5   : > { %2597 = vmatpush1.bf16.msra.mxu1 %v4046_v22 }
  0xf6   : > { %2598 = vmatprep.subr.bf16.mxu1 %v4054_v23 }
  0xf9   : > { %2599 = vmatpush1.bf16.msra.mxu1 %v4052_v24 }
  0xfa   : > { %2600 = vmatprep.subr.bf16.mxu1 %v4060_v25 }
  0xfd   : > { %2601 = vmatpush1.bf16.msra.mxu1 %v4058_v26 }
  0xfe   : > { %2602 = vmatprep.subr.bf16.mxu1 %v4066_v27 }
 0x101   : > { %2603 = vmatpush1.bf16.msra.mxu1 %v4064_v28 }
 0x102   : > { %2604 = vmatprep.subr.bf16.mxu1 %v4072_v29 }
 0x105   : > { %2605 = vmatpush1.bf16.msra.mxu1 %v4070_v30 }
 0x106   : > { %2606 = vmatprep.subr.bf16.mxu1 %v4078_v1 }
 0x109   : > { %2607 = vmatpush1.bf16.msra.mxu1 %v4076_v33 }
 0x10a   : > { %2608 = vmatprep.subr.bf16.mxu1 %v4084_v35 }
 0x10d   : > { %2609 = vmatpush1.bf16.msra.mxu1 %v4082_v37 }
 0x10e   : > { %2610 = vmatprep.subr.bf16.mxu1 %v4090_v39 }
 0x111   : > { %2611 = vmatpush1.bf16.msra.mxu1 %v4088_v41  ;;  %v186_v41 = vsub.s32 3, %v5022_v7 }
 0x112   : > { %2612 = vmatprep.subr.bf16.mxu1 %v4096_v43 }
 0x113   : > { %v187_v43 = vrot.slane %v5027_v13, %v186_v41 }
 0x115   : > { %2613 = vmatpush1.bf16.msra.mxu1 %v4094_v45  ;;  %v215_v45 = vadd.f32 %v187_v43, %v166_v44  ;;  %v4168_v43 = vld [vmem:[#allocation12 + $0x2ac] ss:$16 sps:$4 sm:$0xff]   ;;  %v4163_v44 = vld [vmem:[#allocation12 + $0x2a0] ss:$16 sps:$4 sm:$0xff]  }
 0x116   : > { %2614 = vmatprep.subr.bf16.mxu1 %v4102_v47 }
 0x119   : > { %2615 = vmatpush1.bf16.msra.mxu1 %v4100_v49 }
 0x11a   : > { %2616 = vmatprep.subr.bf16.mxu1 %v4108_v51 }
 0x11d   : > { %2617 = vmatpush1.bf16.msra.mxu1 %v4106_v53 }
 0x11e   : > { %2618 = vmatprep.subr.bf16.mxu1 %v4114_v55 }
 0x121   : > { %2619 = vmatpush1.bf16.msra.mxu1 %v4112_v57  ;;  %v183_v57 = vrot.slane %v5027_v13, %v182_v46 }
 0x122   : > { %2620 = vmatprep.subr.bf16.mxu1 %v4120_v59 }
 0x123   : > { %v214_v4 = vadd.f32 %v183_v57, %v165_v60 }
 0x125   : > { %2621 = vmatpush1.bf16.msra.mxu1 %v4118_v61 }
 0x126   : > { %2622 = vmatprep.subr.bf16.mxu1 %v4126_v63  ;;  %v195_v63 = vrot.slane %v5027_v13, %v194_v52  ;;  %v4172_v52 = vld [vmem:[#allocation12 + $0x2c8] ss:$16 sps:$4 sm:$0xff]  }
 0x129   : > { %2623 = vmatpush1.bf16.msra.mxu1 %v4124_v3  ;;  %v168_v3 = vld [vmem:[#allocation7 + $0x28] sm:$0xff] }
 0x12a   : > { %2624 = vmatprep.subr.bf16.mxu1 %v4132_v5  ;;  %v217_v16 = vadd.f32 %v195_v63, %v168_v3  ;;  %v4178_v63 = vld [vmem:[#allocation12 + $0x2e8] ss:$16 sps:$4 sm:$0xff]  }
 0x12d   : > { %2625 = vmatpush1.bf16.msra.mxu1 %v4130_v8  ;;  %v4133_v8 = vld [vmem:[#allocation12 + $0x200] ss:$16 sps:$4 sm:$0xff]  }
 0x12e   : > { %2635 = vmatprep.subr.bf16.mxu1 %v4138_v10 }
 0x183   : > { %v638_v21 = vpop.f32.mrb[0].mxu1  ;;  %v5036_v31 = vpop.f32.mrb[0].mxu0 }
 0x184   : > { %v768_v22 = vadd.f32 %v638_v21, %v212_v19  ;;  %v640_v23 = vpop.f32.mrb[1].mxu1  ;;  %v722_v1 = vpop.f32.mrb[1].mxu0  ;;  %v4142_v19 = vld [vmem:[#allocation12 + $0x228] ss:$16 sps:$4 sm:$0xff]   ;;  %v4150_v21 = vld [vmem:[#allocation12 + $0x24c] ss:$16 sps:$4 sm:$0xff]  }
 0x185   : > { %v769_v24 = vadd.f32 %v640_v23, %v213_v20  ;;  %v642_v25 = vpop.f32.mrb[2].mxu1  ;;  %v724_v32 = vpop.f32.mrb[2].mxu0  ;;  %v4147_v20 = vld [vmem:[#allocation12 + $0x244] ss:$16 sps:$4 sm:$0xff]  }
 0x186   : > { %v776_v26 = vmin.f32 %v768_v22, 20.0  ;;  %v643_v27 = vpop.f32.mrb[3].mxu1  ;;  %v725_v33 = vpop.f32.mrb[3].mxu0  ;;  %vm816_vm0 = vcmp.gt.f32.partialorder %v768_v22, 20.0  ;;  %v4148_v25 = vld [vmem:[#allocation12 + $0x248] ss:$16 sps:$4 sm:$0xff]  }
 0x187   : > { %v777_v28 = vmin.f32 %v769_v24, 20.0  ;;  %vm817_vm1 = vcmp.gt.f32.partialorder %v769_v24, 20.0  ;;  %v4153_v27 = vld [vmem:[#allocation12 + $0x264] ss:$16 sps:$4 sm:$0xff]  }
 0x188   : > { %v784_v29 = vmul.f32 1.442695, %v776_v26 }
 0x189   : > { %v786_v30 = vmul.f32 1.442695, %v777_v28  ;;  %v4156_v28 = vld [vmem:[#allocation12 + $0x26c] ss:$16 sps:$4 sm:$0xff]  }
 0x18a   : > { %4533 = vpow2.f32 %v784_v29 }
 0x18b   : > { %4535 = vpow2.f32 %v786_v30 }
 0x194   : > { %v4534_v34 = vpop.eup %4533 }
 0x195   : > { %v4536_v35 = vpop.eup %4535  ;;  %v800_v36 = vadd.f32 2.0, %v4534_v34 }
 0x196   : > { %v801_v37 = vadd.f32 2.0, %v4536_v35 }
 0x197   : > { %v808_v38 = vmul.f32 %v4534_v34, %v800_v36  ;;  %v4154_v34 = vld [vmem:[#allocation12 + $0x268] ss:$16 sps:$4 sm:$0xff]   ;;  %v4162_v36 = vld [vmem:[#allocation12 + $0x28c] ss:$16 sps:$4 sm:$0xff]  }
 0x198   : > { %v809_v39 = vmul.f32 %v4536_v35, %v801_v37  ;;  %v4159_v35 = vld [vmem:[#allocation12 + $0x284] ss:$16 sps:$4 sm:$0xff]  }
 0x199   : > { %v824_v40 = vadd.f32 2.0, %v808_v38 }
 0x19a   : > { %v825_v42 = vadd.f32 2.0, %v809_v39 }
 0x19b   : > { %4537 = vrcp.f32 %v824_v40  ;;  %v4160_v40 = vld [vmem:[#allocation12 + $0x288] ss:$16 sps:$4 sm:$0xff]  }
 0x19c   : > { %4539 = vrcp.f32 %v825_v42  ;;  %v4165_v42 = vld [vmem:[#allocation12 + $0x2a4] ss:$16 sps:$4 sm:$0xff]  }
 0x1a3   : > { %v679_v47 = vpop.f32.mrb[4].mxu1 }
 0x1a4   : > { %v681_v48 = vpop.f32.mrb[5].mxu1  ;;  %v5051_v17 = vadd.f32 %v679_v47, %v214_v4  ;;  %v4171_v47 = vld [vmem:[#allocation12 + $0x2c4] ss:$16 sps:$4 sm:$0xff]  }
 0x1a5   : > { %v4538_v49 = vpop.eup %4537  ;;  %v5043_v50 = vadd.f32 %v681_v48, %v215_v45  ;;  %v683_v51 = vpop.f32.mrb[6].mxu1  ;;  %v4166_v45 = vld [vmem:[#allocation12 + $0x2a8] ss:$16 sps:$4 sm:$0xff]   ;;  %v4174_v48 = vld [vmem:[#allocation12 + $0x2cc] ss:$16 sps:$4 sm:$0xff]  }
 0x1a6   : > { %v4540_v53 = vpop.eup %4539  ;;  %v840_v54 = vmul.f32 %v4538_v49, %v808_v38  ;;  %v684_v55 = vpop.f32.mrb[7].mxu1  ;;  %v778_v23 = vmin.f32 %v5051_v17, 20.0  ;;  %v4169_v51 = vld [vmem:[#allocation12 + $0x2c0] ss:$16 sps:$4 sm:$0xff]   ;;  %v4183_v4 = vld [vmem:[#allocation12 + $0x304] ss:$16 sps:$4 sm:$0xff]  }
 0x1a7   : > { %v841_v56 = vmul.f32 %v4540_v53, %v809_v39  ;;  %v779_v58 = vmin.f32 %v5043_v50, 20.0  ;;  %v4157_v39 = vld [vmem:[#allocation12 + $0x280] ss:$16 sps:$4 sm:$0xff]   ;;  %v4177_v55 = vld [vmem:[#allocation12 + $0x2e4] ss:$16 sps:$4 sm:$0xff]   ;;  %vm819_vm2 = vcmp.gt.f32.partialorder %v5043_v50, 20.0 }
 0x1a8   : > { %v848_v59 = vmul.f32 %v840_v54, %v768_v22  ;;  %v788_v32 = vmul.f32 1.442695, %v778_v23  ;;  %vm818_vm4 = vcmp.gt.f32.partialorder %v5051_v17, 20.0 }
 0x1a9   : > { %v849_v61 = vmul.f32 %v841_v56, %v769_v24  ;;  %v790_v62 = vmul.f32 1.442695, %v779_v58  ;;  %v4180_v56 = vld [vmem:[#allocation12 + $0x2ec] ss:$16 sps:$4 sm:$0xff]  }
 0x1aa   : > { %v856_v2 = vsel %vm816_vm0, %v768_v22, %v848_v59  ;;  %v5053_v22 = vadd.f32 %v722_v1, %v217_v16  ;;  %v4151_v1 = vld [vmem:[#allocation12 + $0x260] ss:$16 sps:$4 sm:$0xff]   ;;  %v4189_v16 = vld [vmem:[#allocation12 + $0x324] ss:$16 sps:$4 sm:$0xff]  }
 0x1ab   : > { %4541 = vpow2.f32 %v790_v62  ;;  %v857_v5 = vsel %vm817_vm1, %v769_v24, %v849_v61  ;;  %v864_v10 = vpack.c.bf16 %v856_v2, %v856_v2  ;;  %v4145_v24 = vld [vmem:[#allocation12 + $0x240] ss:$16 sps:$4 sm:$0xff]  }
 0x1ac   : > { %v865_v6 = vpack.c.bf16 %v857_v5, %v857_v5  ;;  %v781_v29 = vmin.f32 %v5053_v22, 20.0  ;;  %4543 = vpow2.f32 %v788_v32  ;;  %v4175_v62 = vld [vmem:[#allocation12 + $0x2e0] ss:$16 sps:$4 sm:$0xff]   ;;  %v4186_v5 = vld [vmem:[#allocation12 + $0x30c] ss:$16 sps:$4 sm:$0xff]   ;;  %vm821_vm3 = vcmp.gt.f32.partialorder %v5053_v22, 20.0 }
 0x1ad   : > { %v4202_v32 = vld [vmem:[#allocation12 + $0x368] ss:$16 sps:$4 sm:$0xff]  }
 0x1ae   : > { %2462 = vmatprep.mubr.bf16.mxu0 %v865_v6  ;;  %2626 = vmatprep.mubr.bf16.mxu1 %v865_v6  ;;  %v794_v37 = vmul.f32 1.442695, %v781_v29  ;;  %v4204_v29 = vld [vmem:[#allocation12 + $0x36c] ss:$16 sps:$4 sm:$0xff]  }
 0x1af   : > { %2463 = vmatmul.mubr.bf16.vlgmr.msra.gmra.mrb[4].mxu0 %v864_v10  ;;  %2627 = vmatmul.mubr.bf16.vlgmr.msra.gmra.mrb[12].mxu1 %v864_v10 }
 0x1b0   : > { %2472 = vmatpush1.bf16.msra.mxu0 %v4133_v8  ;;  %2636 = vmatpush1.bf16.msra.mxu1 %v4136_v9  ;;  %v4181_v9 = vld [vmem:[#allocation12 + $0x300] ss:$16 sps:$4 sm:$0xff]  }
 0x1b1   : > { %2473 = vmatprep.subr.bf16.mxu0 %v4141_v11  ;;  %2637 = vmatprep.subr.bf16.mxu1 %v4144_v15  ;;  %v4184_v11 = vld [vmem:[#allocation12 + $0x308] ss:$16 sps:$4 sm:$0xff]  }
 0x1b4   : > { %2474 = vmatpush1.bf16.msra.mxu0 %v4139_v18  ;;  %2638 = vmatpush1.bf16.msra.mxu1 %v4142_v19  ;;  %v4192_v18 = vld [vmem:[#allocation12 + $0x32c] ss:$16 sps:$4 sm:$0xff]  }
 0x1b5   : > { %v4542_v26 = vpop.eup %4541  ;;  %2475 = vmatprep.subr.bf16.mxu0 %v4147_v20  ;;  %2639 = vmatprep.subr.bf16.mxu1 %v4150_v21  ;;  %v4187_v20 = vld [vmem:[#allocation12 + $0x320] ss:$16 sps:$4 sm:$0xff]   ;;  %v4190_v21 = vld [vmem:[#allocation12 + $0x328] ss:$16 sps:$4 sm:$0xff]  }
 0x1b6   : > { %v803_v30 = vadd.f32 2.0, %v4542_v26  ;;  %v4544_v54 = vpop.eup %4543 }
 0x1b7   : > { %v802_v2 = vadd.f32 2.0, %v4544_v54 }
 0x1b8   : > { %v811_v33 = vmul.f32 %v4542_v26, %v803_v30  ;;  %2476 = vmatpush1.bf16.msra.mxu0 %v4145_v24  ;;  %2640 = vmatpush1.bf16.msra.mxu1 %v4148_v25  ;;  %v4198_v24 = vld [vmem:[#allocation12 + $0x34c] ss:$16 sps:$4 sm:$0xff]   ;;  %v4193_v26 = vld [vmem:[#allocation12 + $0x340] ss:$16 sps:$4 sm:$0xff]  }
 0x1b9   : > { %2477 = vmatprep.subr.bf16.mxu0 %v4153_v27  ;;  %2641 = vmatprep.subr.bf16.mxu1 %v4156_v28  ;;  %v810_v15 = vmul.f32 %v4544_v54, %v802_v2  ;;  %v4196_v27 = vld [vmem:[#allocation12 + $0x348] ss:$16 sps:$4 sm:$0xff]   ;;  %v4201_v28 = vld [vmem:[#allocation12 + $0x364] ss:$16 sps:$4 sm:$0xff]   ;;  %v4199_v30 = vld [vmem:[#allocation12 + $0x360] ss:$16 sps:$4 sm:$0xff]  }
 0x1ba   : > { %v827_v38 = vadd.f32 2.0, %v811_v33  ;;  %v4225_v54 = vld [vmem:[#allocation12 + $0x3e4] ss:$16 sps:$4 sm:$0xff]   ;;  %v4234_v2 = vld [vmem:[#allocation12 + $0x40c] ss:$16 sps:$4 sm:$0xff]  }
 0x1bb   : > { %v826_v23 = vadd.f32 2.0, %v810_v15 }
 0x1bc   : > { %4545 = vrcp.f32 %v827_v38  ;;  %2478 = vmatpush1.bf16.msra.mxu0 %v4151_v1  ;;  %2642 = vmatpush1.bf16.msra.mxu1 %v4154_v34  ;;  %v4210_v1 = vld [vmem:[#allocation12 + $0x38c] ss:$16 sps:$4 sm:$0xff]   ;;  %v4205_v34 = vld [vmem:[#allocation12 + $0x380] ss:$16 sps:$4 sm:$0xff]  }
 0x1bd   : > { %2479 = vmatprep.subr.bf16.mxu0 %v4159_v35  ;;  %2643 = vmatprep.subr.bf16.mxu1 %v4162_v36  ;;  %4547 = vpow2.f32 %v794_v37  ;;  %v4208_v35 = vld [vmem:[#allocation12 + $0x388] ss:$16 sps:$4 sm:$0xff]   ;;  %v4213_v36 = vld [vmem:[#allocation12 + $0x3a4] ss:$16 sps:$4 sm:$0xff]   ;;  %v4216_v37 = vld [vmem:[#allocation12 + $0x3ac] ss:$16 sps:$4 sm:$0xff]  }
 0x1be   : > { %4549 = vrcp.f32 %v826_v23  ;;  %v4246_v23 = vld [vmem:[#allocation12 + $0x44c] ss:$16 sps:$4 sm:$0xff]  }
 0x1c0   : > { %2480 = vmatpush1.bf16.msra.mxu0 %v4157_v39  ;;  %2644 = vmatpush1.bf16.msra.mxu1 %v4160_v40  ;;  %v4211_v40 = vld [vmem:[#allocation12 + $0x3a0] ss:$16 sps:$4 sm:$0xff]  }
 0x1c1   : > { %2481 = vmatprep.subr.bf16.mxu0 %v4165_v42  ;;  %2645 = vmatprep.subr.bf16.mxu1 %v4168_v43  ;;  %v4214_v42 = vld [vmem:[#allocation12 + $0x3a8] ss:$16 sps:$4 sm:$0xff]   ;;  %v4219_v43 = vld [vmem:[#allocation12 + $0x3c4] ss:$16 sps:$4 sm:$0xff]  }
 0x1c3   : > { %v5057_v49 = vpop.f32.mrb[8].mxu1 }
 0x1c4   : > { %2482 = vmatpush1.bf16.msra.mxu0 %v4163_v44  ;;  %2646 = vmatpush1.bf16.msra.mxu1 %v4166_v45  ;;  %v5059_v53 = vpop.f32.mrb[9].mxu1  ;;  %v4222_v44 = vld [vmem:[#allocation12 + $0x3cc] ss:$16 sps:$4 sm:$0xff]  }
 0x1c5   : > { %2483 = vmatprep.subr.bf16.mxu0 %v4171_v47  ;;  %2647 = vmatprep.subr.bf16.mxu1 %v4174_v48  ;;  %v765_v57 = vpop.f32.mrb[10].mxu1  ;;  %v190_v48 = vsub.s32 4, %v5022_v7 }
 0x1c6   : > { %v4546_v58 = vpop.eup %4545  ;;  %v766_v59 = vpop.f32.mrb[11].mxu1 }
 0x1c7   : > { %v4548_v60 = vpop.eup %4547  ;;  %v843_v61 = vmul.f32 %v4546_v58, %v811_v33  ;;  %v4207_v33 = vld [vmem:[#allocation12 + $0x384] ss:$16 sps:$4 sm:$0xff]   ;;  %v191_v59 = vrot.slane %v5027_v13, %v190_v48 }
 0x1c8   : > { %2484 = vmatpush1.bf16.msra.mxu0 %v4169_v51  ;;  %2648 = vmatpush1.bf16.msra.mxu1 %v4172_v52  ;;  %v805_v6 = vadd.f32 2.0, %v4548_v60  ;;  %v4550_v38 = vpop.eup %4549  ;;  %v4217_v51 = vld [vmem:[#allocation12 + $0x3c0] ss:$16 sps:$4 sm:$0xff]   ;;  %v4220_v52 = vld [vmem:[#allocation12 + $0x3c8] ss:$16 sps:$4 sm:$0xff]  }
 0x1c9   : > { %v851_v3 = vmul.f32 %v843_v61, %v5043_v50  ;;  %2485 = vmatprep.subr.bf16.mxu0 %v4177_v55  ;;  %2649 = vmatprep.subr.bf16.mxu1 %v4180_v56  ;;  %v842_v45 = vmul.f32 %v4550_v38, %v810_v15  ;;  %v4228_v55 = vld [vmem:[#allocation12 + $0x3ec] ss:$16 sps:$4 sm:$0xff]   ;;  %v202_v56 = vsub.s32 7, %v5022_v7  ;;  %v4226_v61 = vld [vmem:[#allocation12 + $0x3e8] ss:$16 sps:$4 sm:$0xff]  }
 0x1ca   : > { %v813_v19 = vmul.f32 %v4548_v60, %v805_v6  ;;  %v4223_v60 = vld [vmem:[#allocation12 + $0x3e0] ss:$16 sps:$4 sm:$0xff]   ;;  %v4237_v15 = vld [vmem:[#allocation12 + $0x424] ss:$16 sps:$4 sm:$0xff]  }
 0x1cb   : > { %v859_v8 = vsel %vm819_vm2, %v5043_v50, %v851_v3  ;;  %v4195_v50 = vld [vmem:[#allocation12 + $0x344] ss:$16 sps:$4 sm:$0xff]   ;;  %v850_v57 = vmul.f32 %v842_v45, %v5051_v17  ;;  %v203_v3 = vrot.slane %v5027_v13, %v202_v56  ;;  %v4259_v38 = vld [vmem:[#allocation12 + $0x4a0] ss:$16 sps:$4 sm:$0xff]  }
 0x1cc   : > { %2486 = vmatpush1.bf16.msra.mxu0 %v4175_v62  ;;  %2650 = vmatpush1.bf16.msra.mxu1 %v4178_v63  ;;  %v867_v10 = vpack.c.bf16 %v859_v8, %v859_v8  ;;  %v829_v25 = vadd.f32 2.0, %v813_v19  ;;  %v167_v62 = vld [vmem:[#allocation7 + $0x20] sm:$0xff] }
 0x1cd   : > { %2487 = vmatprep.subr.bf16.mxu0 %v4183_v4  ;;  %2651 = vmatprep.subr.bf16.mxu1 %v4186_v5  ;;  %v4231_v63 = vld [vmem:[#allocation12 + $0x404] ss:$16 sps:$4 sm:$0xff]   ;;  %v858_v4 = vsel %vm818_vm4, %v5051_v17, %v850_v57  ;;  %v170_v5 = vld [vmem:[#allocation7 + $0x38] sm:$0xff]  ;;  %v216_v8 = vadd.f32 %v191_v59, %v167_v62  ;;  %v4235_v17 = vld [vmem:[#allocation12 + $0x420] ss:$16 sps:$4 sm:$0xff]  }
 0x1ce   : > { %2503 = vmatprep.mubr.bf16.mxu0 %v867_v10  ;;  %2667 = vmatprep.mubr.bf16.mxu1 %v867_v10  ;;  %4551 = vrcp.f32 %v829_v25  ;;  %v4232_v10 = vld [vmem:[#allocation12 + $0x408] ss:$16 sps:$4 sm:$0xff]   ;;  %v4241_v25 = vld [vmem:[#allocation12 + $0x440] ss:$16 sps:$4 sm:$0xff]   ;;  %v4273_v45 = vld [vmem:[#allocation12 + $0x4e4] ss:$16 sps:$4 sm:$0xff]  }
 0x1cf   : > { %v4279_v56 = vld [vmem:[#allocation12 + $0x504] ss:$16 sps:$4 sm:$0xff]   ;;  %v4282_v57 = vld [vmem:[#allocation12 + $0x50c] ss:$16 sps:$4 sm:$0xff]   ;;  %v4277_v59 = vld [vmem:[#allocation12 + $0x500] ss:$16 sps:$4 sm:$0xff]  }
 0x1d0   : > { %2488 = vmatpush1.bf16.msra.mxu0 %v4181_v9  ;;  %2652 = vmatpush1.bf16.msra.mxu1 %v4184_v11  ;;  %v4229_v9 = vld [vmem:[#allocation12 + $0x400] ss:$16 sps:$4 sm:$0xff]   ;;  %v866_v11 = vpack.c.bf16 %v858_v4, %v858_v4  ;;  %v4285_v62 = vld [vmem:[#allocation12 + $0x524] ss:$16 sps:$4 sm:$0xff]   ;;  %v4286_v4 = vld [vmem:[#allocation12 + $0x528] ss:$16 sps:$4 sm:$0xff]  }
 0x1d1   : > { %2489 = vmatprep.subr.bf16.mxu0 %v4189_v16  ;;  %2653 = vmatprep.subr.bf16.mxu1 %v4192_v18  ;;  %v4240_v16 = vld [vmem:[#allocation12 + $0x42c] ss:$16 sps:$4 sm:$0xff]   ;;  %v219_v18 = vadd.f32 %v203_v3, %v170_v5  ;;  %v4283_v3 = vld [vmem:[#allocation12 + $0x520] ss:$16 sps:$4 sm:$0xff]  }
 0x1d4   : > { %2490 = vmatpush1.bf16.msra.mxu0 %v4187_v20  ;;  %2654 = vmatpush1.bf16.msra.mxu1 %v4190_v21  ;;  %v5075_v20 = vadd.f32 %v5036_v31, %v216_v8  ;;  %v4243_v21 = vld [vmem:[#allocation12 + $0x444] ss:$16 sps:$4 sm:$0xff]   ;;  %v4244_v31 = vld [vmem:[#allocation12 + $0x448] ss:$16 sps:$4 sm:$0xff]   ;;  %v4294_v8 = vld [vmem:[#allocation12 + $0x54c] ss:$16 sps:$4 sm:$0xff]  }
 0x1d5   : > { %2491 = vmatprep.subr.bf16.mxu0 %v4195_v50  ;;  %2655 = vmatprep.subr.bf16.mxu1 %v4198_v24  ;;  %v5078_v50 = vadd.f32 %v5059_v53, %v219_v18  ;;  %v4250_v53 = vld [vmem:[#allocation12 + $0x468] ss:$16 sps:$4 sm:$0xff]   ;;  %v4295_v18 = vld [vmem:[#allocation12 + $0x560] ss:$16 sps:$4 sm:$0xff]  }
 0x1d6   : > { %v780_v24 = vmin.f32 %v5075_v20, 20.0  ;;  %vm820_vm5 = vcmp.gt.f32.partialorder %v5075_v20, 20.0 }
 0x1d7   : > { %vm823_vm6 = vcmp.gt.f32.partialorder %v5078_v50, 20.0 }
 0x1d8   : > { %2492 = vmatpush1.bf16.msra.mxu0 %v4193_v26  ;;  %2656 = vmatpush1.bf16.msra.mxu1 %v4196_v27  ;;  %v4552_v39 = vpop.eup %4551  ;;  %v4249_v26 = vld [vmem:[#allocation12 + $0x464] ss:$16 sps:$4 sm:$0xff]   ;;  %v4252_v27 = vld [vmem:[#allocation12 + $0x46c] ss:$16 sps:$4 sm:$0xff]  }
 0x1d9   : > { %2493 = vmatprep.subr.bf16.mxu0 %v4201_v28  ;;  %2657 = vmatprep.subr.bf16.mxu1 %v4204_v29  ;;  %v845_v47 = vmul.f32 %v4552_v39, %v813_v19  ;;  %v783_v28 = vmin.f32 %v5078_v50, 20.0  ;;  %v792_v29 = vmul.f32 1.442695, %v780_v24  ;;  %v4262_v39 = vld [vmem:[#allocation12 + $0x4a8] ss:$16 sps:$4 sm:$0xff]  }
 0x1da   : > { %v4309_v24 = vld [vmem:[#allocation12 + $0x5a4] ss:$16 sps:$4 sm:$0xff]  }
 0x1db   : > { %v853_v58 = vmul.f32 %v845_v47, %v5053_v22  ;;  %4553 = vpow2.f32 %v792_v29  ;;  %v4276_v47 = vld [vmem:[#allocation12 + $0x4ec] ss:$16 sps:$4 sm:$0xff]   ;;  %v4315_v29 = vld [vmem:[#allocation12 + $0x5c4] ss:$16 sps:$4 sm:$0xff]  }
 0x1dc   : > { %2494 = vmatpush1.bf16.msra.mxu0 %v4199_v30  ;;  %2658 = vmatpush1.bf16.msra.mxu1 %v4202_v32  ;;  %v4247_v30 = vld [vmem:[#allocation12 + $0x460] ss:$16 sps:$4 sm:$0xff]   ;;  %v4255_v32 = vld [vmem:[#allocation12 + $0x484] ss:$16 sps:$4 sm:$0xff]  }
 0x1dd   : > { %2495 = vmatprep.subr.bf16.mxu0 %v4207_v33  ;;  %2659 = vmatprep.subr.bf16.mxu1 %v4210_v1  ;;  %v861_v6 = vsel %vm821_vm3, %v5053_v22, %v853_v58  ;;  %v4238_v22 = vld [vmem:[#allocation12 + $0x428] ss:$16 sps:$4 sm:$0xff]   ;;  %v4258_v33 = vld [vmem:[#allocation12 + $0x48c] ss:$16 sps:$4 sm:$0xff]   ;;  %v798_v1 = vmul.f32 1.442695, %v783_v28 }
 0x1de   : > { %v869_v19 = vpack.c.bf16 %v861_v6, %v861_v6  ;;  %v4291_v6 = vld [vmem:[#allocation12 + $0x544] ss:$16 sps:$4 sm:$0xff]   ;;  %v4310_v28 = vld [vmem:[#allocation12 + $0x5a8] ss:$16 sps:$4 sm:$0xff]  }
 0x1df   : > { %4555 = vpow2.f32 %v798_v1  ;;  %v4313_v1 = vld [vmem:[#allocation12 + $0x5c0] ss:$16 sps:$4 sm:$0xff]  }
 0x1e0   : > { %2496 = vmatpush1.bf16.msra.mxu0 %v4205_v34  ;;  %2660 = vmatpush1.bf16.msra.mxu1 %v4208_v35  ;;  %v4253_v34 = vld [vmem:[#allocation12 + $0x480] ss:$16 sps:$4 sm:$0xff]   ;;  %v4256_v35 = vld [vmem:[#allocation12 + $0x488] ss:$16 sps:$4 sm:$0xff]  }
 0x1e1   : > { %2497 = vmatprep.subr.bf16.mxu0 %v4213_v36  ;;  %2661 = vmatprep.subr.bf16.mxu1 %v4216_v37  ;;  %v4261_v36 = vld [vmem:[#allocation12 + $0x4a4] ss:$16 sps:$4 sm:$0xff]   ;;  %v4264_v37 = vld [vmem:[#allocation12 + $0x4ac] ss:$16 sps:$4 sm:$0xff]  }
 0x1e4   : > { %2498 = vmatpush1.bf16.msra.mxu0 %v4211_v40  ;;  %2662 = vmatpush1.bf16.msra.mxu1 %v4214_v42  ;;  %v4267_v40 = vld [vmem:[#allocation12 + $0x4c4] ss:$16 sps:$4 sm:$0xff]   ;;  %v4270_v42 = vld [vmem:[#allocation12 + $0x4cc] ss:$16 sps:$4 sm:$0xff]  }
 0x1e5   : > { %2499 = vmatprep.subr.bf16.mxu0 %v4219_v43  ;;  %2663 = vmatprep.subr.bf16.mxu1 %v4222_v44  ;;  %v4265_v43 = vld [vmem:[#allocation12 + $0x4c0] ss:$16 sps:$4 sm:$0xff]   ;;  %v4268_v44 = vld [vmem:[#allocation12 + $0x4c8] ss:$16 sps:$4 sm:$0xff]   ;;  %v4554_v48 = vpop.eup %4553 }
 0x1e8   : > { %2500 = vmatpush1.bf16.msra.mxu0 %v4217_v51  ;;  %2664 = vmatpush1.bf16.msra.mxu1 %v4220_v52  ;;  %v4271_v52 = vld [vmem:[#allocation12 + $0x4e0] ss:$16 sps:$4 sm:$0xff]  }
 0x1e9   : > { %2501 = vmatprep.subr.bf16.mxu0 %v4225_v54  ;;  %2665 = vmatprep.subr.bf16.mxu1 %v4228_v55  ;;  %v4556_v51 = vpop.eup %4555  ;;  %v4274_v54 = vld [vmem:[#allocation12 + $0x4e8] ss:$16 sps:$4 sm:$0xff]   ;;  %v804_v55 = vadd.f32 2.0, %v4554_v48 }
 0x1ea   : > { %v807_v58 = vadd.f32 2.0, %v4556_v51 }
 0x1ec   : > { %2502 = vmatpush1.bf16.msra.mxu0 %v4223_v60  ;;  %2666 = vmatpush1.bf16.msra.mxu1 %v4226_v61  ;;  %v4280_v60 = vld [vmem:[#allocation12 + $0x508] ss:$16 sps:$4 sm:$0xff]   ;;  %v812_v61 = vmul.f32 %v4554_v48, %v804_v55  ;;  %v4333_v55 = vld [vmem:[#allocation12 + $0x624] ss:$16 sps:$4 sm:$0xff]  }
 0x1ed   : > { %2512 = vmatprep.subr.bf16.mxu0 %v4231_v63  ;;  %2676 = vmatprep.subr.bf16.mxu1 %v4234_v2  ;;  %v4288_v63 = vld [vmem:[#allocation12 + $0x52c] ss:$16 sps:$4 sm:$0xff]   ;;  %v815_v2 = vmul.f32 %v4556_v51, %v807_v58 }
 0x1ee   : > { %v828_v5 = vadd.f32 2.0, %v812_v61 }
 0x1ef   : > { %2504 = vmatmul.mubr.bf16.vlgmr.msra.gmra.mrb[4].mxu0 %v866_v11  ;;  %2668 = vmatmul.mubr.bf16.vlgmr.msra.gmra.mrb[12].mxu1 %v866_v11  ;;  %v4292_v11 = vld [vmem:[#allocation12 + $0x548] ss:$16 sps:$4 sm:$0xff]  }
 0x1f0   : > { %2513 = vmatpush1.bf16.msra.mxu0 %v4229_v9  ;;  %2677 = vmatpush1.bf16.msra.mxu1 %v4232_v10  ;;  %v831_v9 = vadd.f32 2.0, %v815_v2  ;;  %v4289_v10 = vld [vmem:[#allocation12 + $0x540] ss:$16 sps:$4 sm:$0xff]   ;;  %4557 = vrcp.f32 %v828_v5  ;;  %v4346_v5 = vld [vmem:[#allocation12 + $0x668] ss:$16 sps:$4 sm:$0xff]  }
 0x1f1   : > { %2514 = vmatprep.subr.bf16.mxu0 %v4237_v15  ;;  %2678 = vmatprep.subr.bf16.mxu1 %v4240_v16  ;;  %v4297_v15 = vld [vmem:[#allocation12 + $0x564] ss:$16 sps:$4 sm:$0xff]   ;;  %v4300_v16 = vld [vmem:[#allocation12 + $0x56c] ss:$16 sps:$4 sm:$0xff]  }
 0x1f2   : > { %2544 = vmatprep.mubr.bf16.mxu0 %v869_v19  ;;  %2708 = vmatprep.mubr.bf16.mxu1 %v869_v19  ;;  %4559 = vrcp.f32 %v831_v9  ;;  %v4298_v19 = vld [vmem:[#allocation12 + $0x568] ss:$16 sps:$4 sm:$0xff]   ;;  %v4349_v9 = vld [vmem:[#allocation12 + $0x680] ss:$16 sps:$4 sm:$0xff]  }
 0x1f4   : > { %2515 = vmatpush1.bf16.msra.mxu0 %v4235_v17  ;;  %2679 = vmatpush1.bf16.msra.mxu1 %v4238_v22  ;;  %v4303_v17 = vld [vmem:[#allocation12 + $0x584] ss:$16 sps:$4 sm:$0xff]   ;;  %v4306_v22 = vld [vmem:[#allocation12 + $0x58c] ss:$16 sps:$4 sm:$0xff]  }
 0x1f5   : > { %2516 = vmatprep.subr.bf16.mxu0 %v4243_v21  ;;  %2680 = vmatprep.subr.bf16.mxu1 %v4246_v23  ;;  %v4301_v21 = vld [vmem:[#allocation12 + $0x580] ss:$16 sps:$4 sm:$0xff]   ;;  %v4304_v23 = vld [vmem:[#allocation12 + $0x588] ss:$16 sps:$4 sm:$0xff]  }
 0x1f8   : > { %2517 = vmatpush1.bf16.msra.mxu0 %v4241_v25  ;;  %2681 = vmatpush1.bf16.msra.mxu1 %v4244_v31  ;;  %v4312_v25 = vld [vmem:[#allocation12 + $0x5ac] ss:$16 sps:$4 sm:$0xff]  }
 0x1f9   : > { %2518 = vmatprep.subr.bf16.mxu0 %v4249_v26  ;;  %2682 = vmatprep.subr.bf16.mxu1 %v4252_v27  ;;  %v4307_v27 = vld [vmem:[#allocation12 + $0x5a0] ss:$16 sps:$4 sm:$0xff]  }
 0x1fa   : > { %v4558_v31 = vpop.eup %4557 }
 0x1fc   : > { %2519 = vmatpush1.bf16.msra.mxu0 %v4247_v30  ;;  %2683 = vmatpush1.bf16.msra.mxu1 %v4250_v53  ;;  %v4560_v26 = vpop.eup %4559  ;;  %v4318_v30 = vld [vmem:[#allocation12 + $0x5cc] ss:$16 sps:$4 sm:$0xff]   ;;  %v844_v53 = vmul.f32 %v4558_v31, %v812_v61  ;;  %v4367_v31 = vld [vmem:[#allocation12 + $0x6e0] ss:$16 sps:$4 sm:$0xff]  }
 0x1fd   : > { %2520 = vmatprep.subr.bf16.mxu0 %v4255_v32  ;;  %2684 = vmatprep.subr.bf16.mxu1 %v4258_v33  ;;  %v847_v32 = vmul.f32 %v4560_v26, %v815_v2  ;;  %v198_v33 = vsub.s32 6, %v5022_v7  ;;  %v4348_v2 = vld [vmem:[#allocation12 + $0x66c] ss:$16 sps:$4 sm:$0xff]   ;;  %v4370_v26 = vld [vmem:[#allocation12 + $0x6e8] ss:$16 sps:$4 sm:$0xff]  }
 0x1fe   : > { %v4475_v7 = vld [vmem:[#allocation13 + $0x120] ss:$8 sps:$4 sm:$0xff]  }
 0x200   : > { %2521 = vmatpush1.bf16.msra.mxu0 %v4253_v34  ;;  %2685 = vmatpush1.bf16.msra.mxu1 %v4256_v35  ;;  %v4316_v34 = vld [vmem:[#allocation12 + $0x5c8] ss:$16 sps:$4 sm:$0xff]   ;;  %v4321_v35 = vld [vmem:[#allocation12 + $0x5e4] ss:$16 sps:$4 sm:$0xff]  }
 0x201   : > { %2522 = vmatprep.subr.bf16.mxu0 %v4261_v36  ;;  %2686 = vmatprep.subr.bf16.mxu1 %v4264_v37  ;;  %v4324_v36 = vld [vmem:[#allocation12 + $0x5ec] ss:$16 sps:$4 sm:$0xff]   ;;  %v852_v37 = vmul.f32 %v844_v53, %v5075_v20  ;;  %v4376_v53 = vld [vmem:[#allocation12 + $0x708] ss:$16 sps:$4 sm:$0xff]  }
 0x204   : > { %2523 = vmatpush1.bf16.msra.mxu0 %v4259_v38  ;;  %2687 = vmatpush1.bf16.msra.mxu1 %v4262_v39  ;;  %v855_v38 = vmul.f32 %v847_v32, %v5078_v50  ;;  %v199_v39 = vrot.slane %v5027_v13, %v198_v33  ;;  %v4328_v13 = vld [vmem:[#allocation12 + $0x608] ss:$16 sps:$4 sm:$0xff]   ;;  %v4381_v33 = vld [vmem:[#allocation12 + $0x724] ss:$16 sps:$4 sm:$0xff]  }
 0x205   : > { %2524 = vmatprep.subr.bf16.mxu0 %v4267_v40  ;;  %2688 = vmatprep.subr.bf16.mxu1 %v4270_v42  ;;  %v4319_v40 = vld [vmem:[#allocation12 + $0x5e0] ss:$16 sps:$4 sm:$0xff]   ;;  %v4322_v42 = vld [vmem:[#allocation12 + $0x5e8] ss:$16 sps:$4 sm:$0xff]  }
 0x206   : > { %v863_v48 = vsel %vm823_vm6, %v5078_v50, %v855_v38  ;;  %v4334_v50 = vld [vmem:[#allocation12 + $0x628] ss:$16 sps:$4 sm:$0xff]   ;;  %v4390_v38 = vld [vmem:[#allocation12 + $0x74c] ss:$16 sps:$4 sm:$0xff]  }
 0x208   : > { %2525 = vmatpush1.bf16.msra.mxu0 %v4265_v43  ;;  %2689 = vmatpush1.bf16.msra.mxu1 %v4268_v44  ;;  %v169_v43 = vld [vmem:[#allocation7 + $0x30] sm:$0xff] }
 0x209   : > { %2526 = vmatprep.subr.bf16.mxu0 %v4273_v45  ;;  %2690 = vmatprep.subr.bf16.mxu1 %v4276_v47  ;;  %v4327_v44 = vld [vmem:[#allocation12 + $0x604] ss:$16 sps:$4 sm:$0xff]   ;;  %v4330_v45 = vld [vmem:[#allocation12 + $0x60c] ss:$16 sps:$4 sm:$0xff]   ;;  %v860_v47 = vsel %vm820_vm5, %v5075_v20, %v852_v37  ;;  %v218_v51 = vadd.f32 %v199_v39, %v169_v43  ;;  %v4331_v20 = vld [vmem:[#allocation12 + $0x620] ss:$16 sps:$4 sm:$0xff]  }
 0x20a   : > { %v4387_v37 = vld [vmem:[#allocation12 + $0x744] ss:$16 sps:$4 sm:$0xff]   ;;  %v4385_v39 = vld [vmem:[#allocation12 + $0x740] ss:$16 sps:$4 sm:$0xff]   ;;  %v4396_v43 = vld [vmem:[#allocation12 + $0x76c] ss:$16 sps:$4 sm:$0xff]  }
 0x20b   : > { %v5091_v58 = vadd.f32 %v5057_v49, %v218_v51  ;;  %v4345_v49 = vld [vmem:[#allocation12 + $0x664] ss:$16 sps:$4 sm:$0xff]   ;;  %v4397_v51 = vld [vmem:[#allocation12 + $0x780] ss:$16 sps:$4 sm:$0xff]  }
 0x20c   : > { %2527 = vmatpush1.bf16.msra.mxu0 %v4271_v52  ;;  %2691 = vmatpush1.bf16.msra.mxu1 %v4274_v54  ;;  %v4325_v52 = vld [vmem:[#allocation12 + $0x600] ss:$16 sps:$4 sm:$0xff]   ;;  %v868_v54 = vpack.c.bf16 %v860_v47, %v860_v47  ;;  %v4399_v47 = vld [vmem:[#allocation12 + $0x784] ss:$16 sps:$4 sm:$0xff]  }
 0x20d   : > { %2528 = vmatprep.subr.bf16.mxu0 %v4279_v56  ;;  %2692 = vmatprep.subr.bf16.mxu1 %v4282_v57  ;;  %v4336_v56 = vld [vmem:[#allocation12 + $0x62c] ss:$16 sps:$4 sm:$0xff]   ;;  %v871_v57 = vpack.c.bf16 %v863_v48, %v863_v48  ;;  %v782_v61 = vmin.f32 %v5091_v58, 20.0  ;;  %vm822_vm7 = vcmp.gt.f32.partialorder %v5091_v58, 20.0 }
 0x20e   : > { %v4402_v48 = vld [vmem:[#allocation12 + $0x78c] ss:$16 sps:$4 sm:$0xff]  }
 0x210   : > { %2529 = vmatpush1.bf16.msra.mxu0 %v4277_v59  ;;  %2693 = vmatpush1.bf16.msra.mxu1 %v4280_v60  ;;  %v4339_v59 = vld [vmem:[#allocation12 + $0x644] ss:$16 sps:$4 sm:$0xff]   ;;  %v4342_v60 = vld [vmem:[#allocation12 + $0x64c] ss:$16 sps:$4 sm:$0xff]  }
 0x211   : > { %2530 = vmatprep.subr.bf16.mxu0 %v4285_v62  ;;  %2694 = vmatprep.subr.bf16.mxu1 %v4288_v63  ;;  %v4337_v62 = vld [vmem:[#allocation12 + $0x640] ss:$16 sps:$4 sm:$0xff]   ;;  %v4340_v63 = vld [vmem:[#allocation12 + $0x648] ss:$16 sps:$4 sm:$0xff]  }
 0x214   : > { %2531 = vmatpush1.bf16.msra.mxu0 %v4283_v3  ;;  %2695 = vmatpush1.bf16.msra.mxu1 %v4286_v4  ;;  %v796_v3 = vmul.f32 1.442695, %v782_v61  ;;  %v4343_v4 = vld [vmem:[#allocation12 + $0x660] ss:$16 sps:$4 sm:$0xff]   ;;  %v4412_v61 = vld [vmem:[#allocation12 + $0x7c8] ss:$16 sps:$4 sm:$0xff]  }
 0x215   : > { %2532 = vmatprep.subr.bf16.mxu0 %v4291_v6  ;;  %2696 = vmatprep.subr.bf16.mxu1 %v4294_v8  ;;  %v4351_v6 = vld [vmem:[#allocation12 + $0x684] ss:$16 sps:$4 sm:$0xff]   ;;  %v4354_v8 = vld [vmem:[#allocation12 + $0x68c] ss:$16 sps:$4 sm:$0xff]  }
 0x216   : > { %4561 = vpow2.f32 %v796_v3  ;;  %v4418_v3 = vld [vmem:[#allocation12 + $0x7e8] ss:$16 sps:$4 sm:$0xff]  }
 0x218   : > { %2533 = vmatpush1.bf16.msra.mxu0 %v4289_v10  ;;  %2697 = vmatpush1.bf16.msra.mxu1 %v4292_v11  ;;  %v4352_v10 = vld [vmem:[#allocation12 + $0x688] ss:$16 sps:$4 sm:$0xff]   ;;  %v4357_v11 = vld [vmem:[#allocation12 + $0x6a4] ss:$16 sps:$4 sm:$0xff]  }
 0x219   : > { %2534 = vmatprep.subr.bf16.mxu0 %v4297_v15  ;;  %2698 = vmatprep.subr.bf16.mxu1 %v4300_v16  ;;  %v4360_v15 = vld [vmem:[#allocation12 + $0x6ac] ss:$16 sps:$4 sm:$0xff]   ;;  %v4355_v16 = vld [vmem:[#allocation12 + $0x6a0] ss:$16 sps:$4 sm:$0xff]  }
 0x21c   : > { %2535 = vmatpush1.bf16.msra.mxu0 %v4295_v18  ;;  %2699 = vmatpush1.bf16.msra.mxu1 %v4298_v19  ;;  %v4358_v18 = vld [vmem:[#allocation12 + $0x6a8] ss:$16 sps:$4 sm:$0xff]   ;;  %v4363_v19 = vld [vmem:[#allocation12 + $0x6c4] ss:$16 sps:$4 sm:$0xff]  }
 0x21d   : > { %2536 = vmatprep.subr.bf16.mxu0 %v4303_v17  ;;  %2700 = vmatprep.subr.bf16.mxu1 %v4306_v22  ;;  %v4366_v17 = vld [vmem:[#allocation12 + $0x6cc] ss:$16 sps:$4 sm:$0xff]   ;;  %v4361_v22 = vld [vmem:[#allocation12 + $0x6c0] ss:$16 sps:$4 sm:$0xff]  }
 0x220   : > { %2537 = vmatpush1.bf16.msra.mxu0 %v4301_v21  ;;  %2701 = vmatpush1.bf16.msra.mxu1 %v4304_v23  ;;  %v4364_v21 = vld [vmem:[#allocation12 + $0x6c8] ss:$16 sps:$4 sm:$0xff]   ;;  %v4369_v23 = vld [vmem:[#allocation12 + $0x6e4] ss:$16 sps:$4 sm:$0xff]  }
 0x221   : > { %2538 = vmatprep.subr.bf16.mxu0 %v4309_v24  ;;  %2702 = vmatprep.subr.bf16.mxu1 %v4312_v25  ;;  %v4372_v24 = vld [vmem:[#allocation12 + $0x6ec] ss:$16 sps:$4 sm:$0xff]   ;;  %v4562_v25 = vpop.eup %4561 }
 0x224   : > { %2539 = vmatpush1.bf16.msra.mxu0 %v4307_v27  ;;  %2703 = vmatpush1.bf16.msra.mxu1 %v4310_v28  ;;  %v806_v27 = vadd.f32 2.0, %v4562_v25  ;;  %v4375_v28 = vld [vmem:[#allocation12 + $0x704] ss:$16 sps:$4 sm:$0xff]  }
 0x225   : > { %2540 = vmatprep.subr.bf16.mxu0 %v4315_v29  ;;  %2704 = vmatprep.subr.bf16.mxu1 %v4318_v30  ;;  %v4378_v29 = vld [vmem:[#allocation12 + $0x70c] ss:$16 sps:$4 sm:$0xff]   ;;  %v4373_v30 = vld [vmem:[#allocation12 + $0x700] ss:$16 sps:$4 sm:$0xff]  }
 0x226   : > { %v814_v32 = vmul.f32 %v4562_v25, %v806_v27  ;;  %v4442_v25 = vld [vmem:[#allocation13 + $0x70] ss:$8 sps:$4 sm:$0xff]   ;;  %v4450_v27 = vld [vmem:[#allocation13 + $0x94] ss:$8 sps:$4 sm:$0xff]  }
 0x228   : > { %2541 = vmatpush1.bf16.msra.mxu0 %v4313_v1  ;;  %2705 = vmatpush1.bf16.msra.mxu1 %v4316_v34  ;;  %v4384_v1 = vld [vmem:[#allocation12 + $0x72c] ss:$16 sps:$4 sm:$0xff]   ;;  %v4379_v34 = vld [vmem:[#allocation12 + $0x720] ss:$16 sps:$4 sm:$0xff]  }
 0x229   : > { %2542 = vmatprep.subr.bf16.mxu0 %v4321_v35  ;;  %2706 = vmatprep.subr.bf16.mxu1 %v4324_v36  ;;  %v4382_v35 = vld [vmem:[#allocation12 + $0x728] ss:$16 sps:$4 sm:$0xff]   ;;  %v830_v36 = vadd.f32 2.0, %v814_v32 }
 0x22b   : > { %4563 = vrcp.f32 %v830_v36  ;;  %v4465_v36 = vld [vmem:[#allocation13 + $0xe4] ss:$8 sps:$4 sm:$0xff]  }
 0x22c   : > { %2543 = vmatpush1.bf16.msra.mxu0 %v4319_v40  ;;  %2707 = vmatpush1.bf16.msra.mxu1 %v4322_v42  ;;  %v4388_v40 = vld [vmem:[#allocation12 + $0x748] ss:$16 sps:$4 sm:$0xff]   ;;  %v4393_v42 = vld [vmem:[#allocation12 + $0x764] ss:$16 sps:$4 sm:$0xff]  }
 0x22d   : > { %2553 = vmatprep.subr.bf16.mxu0 %v4327_v44  ;;  %2717 = vmatprep.subr.bf16.mxu1 %v4330_v45  ;;  %v4391_v44 = vld [vmem:[#allocation12 + $0x760] ss:$16 sps:$4 sm:$0xff]   ;;  %v4394_v45 = vld [vmem:[#allocation12 + $0x768] ss:$16 sps:$4 sm:$0xff]  }
 0x22f   : > { %2545 = vmatmul.mubr.bf16.vlgmr.msra.gmra.mrb[4].mxu0 %v868_v54  ;;  %2709 = vmatmul.mubr.bf16.vlgmr.msra.gmra.mrb[12].mxu1 %v868_v54  ;;  %v4408_v54 = vld [vmem:[#allocation12 + $0x7ac] ss:$16 sps:$4 sm:$0xff]  }
 0x230   : > { %2554 = vmatpush1.bf16.msra.mxu0 %v4325_v52  ;;  %2718 = vmatpush1.bf16.msra.mxu1 %v4328_v13  ;;  %v4400_v52 = vld [vmem:[#allocation12 + $0x788] ss:$16 sps:$4 sm:$0xff]   ;;  %v4405_v13 = vld [vmem:[#allocation12 + $0x7a4] ss:$16 sps:$4 sm:$0xff]  }
 0x231   : > { %2555 = vmatprep.subr.bf16.mxu0 %v4333_v55  ;;  %2719 = vmatprep.subr.bf16.mxu1 %v4336_v56  ;;  %v4403_v56 = vld [vmem:[#allocation12 + $0x7a0] ss:$16 sps:$4 sm:$0xff]  }
 0x232   : > { %2585 = vmatprep.mubr.bf16.mxu0 %v871_v57  ;;  %2749 = vmatprep.mubr.bf16.mxu1 %v871_v57  ;;  %v4406_v57 = vld [vmem:[#allocation12 + $0x7a8] ss:$16 sps:$4 sm:$0xff]  }
 0x234   : > { %2556 = vmatpush1.bf16.msra.mxu0 %v4331_v20  ;;  %2720 = vmatpush1.bf16.msra.mxu1 %v4334_v50  ;;  %v4411_v20 = vld [vmem:[#allocation12 + $0x7c4] ss:$16 sps:$4 sm:$0xff]   ;;  %v4414_v50 = vld [vmem:[#allocation12 + $0x7cc] ss:$16 sps:$4 sm:$0xff]  }
 0x235   : > { %2557 = vmatprep.subr.bf16.mxu0 %v4339_v59  ;;  %2721 = vmatprep.subr.bf16.mxu1 %v4342_v60  ;;  %v4564_v55 = vpop.eup %4563  ;;  %v4409_v60 = vld [vmem:[#allocation12 + $0x7c0] ss:$16 sps:$4 sm:$0xff]  }
 0x236   : > { %v846_v59 = vmul.f32 %v4564_v55, %v814_v32  ;;  %v4454_v32 = vld [vmem:[#allocation13 + $0xb0] ss:$8 sps:$4 sm:$0xff]  }
 0x238   : > { %2558 = vmatpush1.bf16.msra.mxu0 %v4337_v62  ;;  %2722 = vmatpush1.bf16.msra.mxu1 %v4340_v63  ;;  %v4417_v62 = vld [vmem:[#allocation12 + $0x7e4] ss:$16 sps:$4 sm:$0xff]   ;;  %v4420_v63 = vld [vmem:[#allocation12 + $0x7ec] ss:$16 sps:$4 sm:$0xff]  }
 0x239   : > { %2559 = vmatprep.subr.bf16.mxu0 %v4345_v49  ;;  %2723 = vmatprep.subr.bf16.mxu1 %v4348_v2  ;;  %v854_v49 = vmul.f32 %v846_v59, %v5091_v58  ;;  %v4415_v2 = vld [vmem:[#allocation12 + $0x7e0] ss:$16 sps:$4 sm:$0xff]  }
 0x23c   : > { %2560 = vmatpush1.bf16.msra.mxu0 %v4343_v4  ;;  %2724 = vmatpush1.bf16.msra.mxu1 %v4346_v5  ;;  %v4423_v4 = vld [vmem:[#allocation13 + $0x4] ss:$8 sps:$4 sm:$0xff]   ;;  %v862_v5 = vsel %vm822_vm7, %v5091_v58, %v854_v49 }
 0x23d   : > { %2561 = vmatprep.subr.bf16.mxu0 %v4351_v6  ;;  %2725 = vmatprep.subr.bf16.mxu1 %v4354_v8  ;;  %v4421_v6 = vld [vmem:[#allocation13] ss:$8 sps:$4 sm:$0xff]   ;;  %v870_v8 = vpack.c.bf16 %v862_v5, %v862_v5  ;;  %v4435_v58 = vld [vmem:[#allocation13 + $0x44] ss:$8 sps:$4 sm:$0xff]  }
 0x240   : > { %2562 = vmatpush1.bf16.msra.mxu0 %v4349_v9  ;;  %2726 = vmatpush1.bf16.msra.mxu1 %v4352_v10  ;;  %v4426_v9 = vld [vmem:[#allocation13 + $0x14] ss:$8 sps:$4 sm:$0xff]   ;;  %v4424_v10 = vld [vmem:[#allocation13 + $0x10] ss:$8 sps:$4 sm:$0xff]  }
 0x241   : > { %2563 = vmatprep.subr.bf16.mxu0 %v4357_v11  ;;  %2727 = vmatprep.subr.bf16.mxu1 %v4360_v15  ;;  %v4429_v11 = vld [vmem:[#allocation13 + $0x24] ss:$8 sps:$4 sm:$0xff]   ;;  %v4427_v15 = vld [vmem:[#allocation13 + $0x20] ss:$8 sps:$4 sm:$0xff]  }
 0x244   : > { %2564 = vmatpush1.bf16.msra.mxu0 %v4355_v16  ;;  %2728 = vmatpush1.bf16.msra.mxu1 %v4358_v18  ;;  %v4432_v16 = vld [vmem:[#allocation13 + $0x34] ss:$8 sps:$4 sm:$0xff]   ;;  %v4430_v18 = vld [vmem:[#allocation13 + $0x30] ss:$8 sps:$4 sm:$0xff]  }
 0x245   : > { %2565 = vmatprep.subr.bf16.mxu0 %v4363_v19  ;;  %2729 = vmatprep.subr.bf16.mxu1 %v4366_v17  ;;  %v4433_v19 = vld [vmem:[#allocation13 + $0x40] ss:$8 sps:$4 sm:$0xff]   ;;  %v4438_v17 = vld [vmem:[#allocation13 + $0x54] ss:$8 sps:$4 sm:$0xff]  }
 0x248   : > { %2566 = vmatpush1.bf16.msra.mxu0 %v4361_v22  ;;  %2730 = vmatpush1.bf16.msra.mxu1 %v4364_v21  ;;  %v4436_v22 = vld [vmem:[#allocation13 + $0x50] ss:$8 sps:$4 sm:$0xff]   ;;  %v4441_v21 = vld [vmem:[#allocation13 + $0x64] ss:$8 sps:$4 sm:$0xff]  }
 0x249   : > { %2567 = vmatprep.subr.bf16.mxu0 %v4369_v23  ;;  %2731 = vmatprep.subr.bf16.mxu1 %v4372_v24  ;;  %v4439_v23 = vld [vmem:[#allocation13 + $0x60] ss:$8 sps:$4 sm:$0xff]   ;;  %v4444_v24 = vld [vmem:[#allocation13 + $0x74] ss:$8 sps:$4 sm:$0xff]  }
 0x24c   : > { %2568 = vmatpush1.bf16.msra.mxu0 %v4367_v31  ;;  %2732 = vmatpush1.bf16.msra.mxu1 %v4370_v26  ;;  %v4447_v31 = vld [vmem:[#allocation13 + $0x84] ss:$8 sps:$4 sm:$0xff]   ;;  %v4445_v26 = vld [vmem:[#allocation13 + $0x80] ss:$8 sps:$4 sm:$0xff]  }
 0x24d   : > { %2569 = vmatprep.subr.bf16.mxu0 %v4375_v28  ;;  %2733 = vmatprep.subr.bf16.mxu1 %v4378_v29  ;;  %v4448_v28 = vld [vmem:[#allocation13 + $0x90] ss:$8 sps:$4 sm:$0xff]   ;;  %v4453_v29 = vld [vmem:[#allocation13 + $0xa4] ss:$8 sps:$4 sm:$0xff]  }
 0x250   : > { %2570 = vmatpush1.bf16.msra.mxu0 %v4373_v30  ;;  %2734 = vmatpush1.bf16.msra.mxu1 %v4376_v53  ;;  %v4451_v30 = vld [vmem:[#allocation13 + $0xa0] ss:$8 sps:$4 sm:$0xff]   ;;  %v4456_v53 = vld [vmem:[#allocation13 + $0xb4] ss:$8 sps:$4 sm:$0xff]  }
 0x251   : > { %2571 = vmatprep.subr.bf16.mxu0 %v4381_v33  ;;  %2735 = vmatprep.subr.bf16.mxu1 %v4384_v1  ;;  %v4459_v33 = vld [vmem:[#allocation13 + $0xc4] ss:$8 sps:$4 sm:$0xff]   ;;  %v4457_v1 = vld [vmem:[#allocation13 + $0xc0] ss:$8 sps:$4 sm:$0xff]  }
 0x254   : > { %2572 = vmatpush1.bf16.msra.mxu0 %v4379_v34  ;;  %2736 = vmatpush1.bf16.msra.mxu1 %v4382_v35  ;;  %v4462_v34 = vld [vmem:[#allocation13 + $0xd4] ss:$8 sps:$4 sm:$0xff]   ;;  %v4460_v35 = vld [vmem:[#allocation13 + $0xd0] ss:$8 sps:$4 sm:$0xff]  }
 0x255   : > { %2573 = vmatprep.subr.bf16.mxu0 %v4387_v37  ;;  %2737 = vmatprep.subr.bf16.mxu1 %v4390_v38  ;;  %v4463_v37 = vld [vmem:[#allocation13 + $0xe0] ss:$8 sps:$4 sm:$0xff]   ;;  %v4468_v38 = vld [vmem:[#allocation13 + $0xf4] ss:$8 sps:$4 sm:$0xff]  }
 0x258   : > { %2574 = vmatpush1.bf16.msra.mxu0 %v4385_v39  ;;  %2738 = vmatpush1.bf16.msra.mxu1 %v4388_v40  ;;  %v4466_v39 = vld [vmem:[#allocation13 + $0xf0] ss:$8 sps:$4 sm:$0xff]   ;;  %v4471_v40 = vld [vmem:[#allocation13 + $0x104] ss:$8 sps:$4 sm:$0xff]  }
 0x259   : > { %2575 = vmatprep.subr.bf16.mxu0 %v4393_v42  ;;  %2739 = vmatprep.subr.bf16.mxu1 %v4396_v43  ;;  %v1128_v42 = vld [vmem:[%s5148_s7] sm:$0xf] }
 0x25a   : > { %v1133_v43 = vrot.slane %v1128_v42, %v5025_v12 }
 0x25c   : > { %2576 = vmatpush1.bf16.msra.mxu0 %v4391_v44  ;;  %2740 = vmatpush1.bf16.msra.mxu1 %v4394_v45  ;;  %v1137_v44 = vrot.slane %v1128_v42, %v5030_v14  ;;  %v1145_v45 = vrot.slane %v1128_v42, %v186_v41 }
 0x25d   : > { %2577 = vmatprep.subr.bf16.mxu0 %v4399_v47  ;;  %2741 = vmatprep.subr.bf16.mxu1 %v4402_v48 }
 0x260   : > { %2578 = vmatpush1.bf16.msra.mxu0 %v4397_v51  ;;  %2742 = vmatpush1.bf16.msra.mxu1 %v4400_v52 }
 0x261   : > { %2579 = vmatprep.subr.bf16.mxu0 %v4405_v13  ;;  %2743 = vmatprep.subr.bf16.mxu1 %v4408_v54 }
 0x264   : > { %2580 = vmatpush1.bf16.msra.mxu0 %v4403_v56  ;;  %2744 = vmatpush1.bf16.msra.mxu1 %v4406_v57 }
 0x265   : > { %2581 = vmatprep.subr.bf16.mxu0 %v4411_v20  ;;  %2745 = vmatprep.subr.bf16.mxu1 %v4414_v50 }
 0x268   : > { %2582 = vmatpush1.bf16.msra.mxu0 %v4409_v60  ;;  %2746 = vmatpush1.bf16.msra.mxu1 %v4412_v61 }
 0x269   : > { %2583 = vmatprep.subr.bf16.mxu0 %v4417_v62  ;;  %2747 = vmatprep.subr.bf16.mxu1 %v4420_v63 }
 0x26c   : > { %2584 = vmatpush1.bf16.msra.mxu0 %v4415_v2  ;;  %2748 = vmatpush1.bf16.msra.mxu1 %v4418_v3 }
 0x26d   : > { %3202 = vmatprep.subr.bf16.mxu0 %v4423_v4 }
 0x26f   : > { %2586 = vmatmul.mubr.bf16.vlgmr.msra.gmra.mrb[4].mxu0 %v870_v8  ;;  %2750 = vmatmul.mubr.bf16.vlgmr.msra.gmra.mrb[12].mxu1 %v870_v8 }
 0x270   : > { %3203 = vmatpush1.bf16.msra.mxu0 %v4421_v6 }
 0x271   : > { %3204 = vmatprep.subr.bf16.mxu0 %v4426_v9 }
 0x274   : > { %3205 = vmatpush1.bf16.msra.mxu0 %v4424_v10 }
 0x275   : > { %3206 = vmatprep.subr.bf16.mxu0 %v4429_v11 }
 0x278   : > { %3207 = vmatpush1.bf16.msra.mxu0 %v4427_v15 }
 0x279   : > { %3208 = vmatprep.subr.bf16.mxu0 %v4432_v16 }
 0x27c   : > { %3209 = vmatpush1.bf16.msra.mxu0 %v4430_v18 }
 0x27d   : > { %3210 = vmatprep.subr.bf16.mxu0 %v4435_v58 }
 0x280   : > { %3211 = vmatpush1.bf16.msra.mxu0 %v4433_v19 }
 0x281   : > { %3212 = vmatprep.subr.bf16.mxu0 %v4438_v17 }
 0x284   : > { %3213 = vmatpush1.bf16.msra.mxu0 %v4436_v22 }
 0x285   : > { %3214 = vmatprep.subr.bf16.mxu0 %v4441_v21 }
 0x288   : > { %3215 = vmatpush1.bf16.msra.mxu0 %v4439_v23 }
 0x289   : > { %3216 = vmatprep.subr.bf16.mxu0 %v4444_v24 }
 0x28c   : > { %3217 = vmatpush1.bf16.msra.mxu0 %v4442_v25 }
 0x28d   : > { %3218 = vmatprep.subr.bf16.mxu0 %v4447_v31 }
 0x290   : > { %3219 = vmatpush1.bf16.msra.mxu0 %v4445_v26 }
 0x291   : > { %3220 = vmatprep.subr.bf16.mxu0 %v4450_v27  ;;  %v1141_v27 = vrot.slane %v1128_v42, %v182_v46  ;;  %v4480_v46 = vld [vmem:[#allocation13 + $0x134] ss:$8 sps:$4 sm:$0xff]  }
 0x292   : > { %v4486_v42 = vld [vmem:[#allocation13 + $0x154] ss:$8 sps:$4 sm:$0xff]  }
 0x294   : > { %3221 = vmatpush1.bf16.msra.mxu0 %v4448_v28 }
 0x295   : > { %3222 = vmatprep.subr.bf16.mxu0 %v4453_v29  ;;  %v4469_v29 = vld [vmem:[#allocation13 + $0x100] ss:$8 sps:$4 sm:$0xff]  }
 0x298   : > { %3223 = vmatpush1.bf16.msra.mxu0 %v4451_v30 }
 0x299   : > { %3224 = vmatprep.subr.bf16.mxu0 %v4456_v53 }
 0x29c   : > { %3225 = vmatpush1.bf16.msra.mxu0 %v4454_v32  ;;  %v4474_v32 = vld [vmem:[#allocation13 + $0x114] ss:$8 sps:$4 sm:$0xff]  }
 0x29d   : > { %3226 = vmatprep.subr.bf16.mxu0 %v4459_v33 }
 0x2a0   : > { %3227 = vmatpush1.bf16.msra.mxu0 %v4457_v1 }
 0x2a1   : > { %3228 = vmatprep.subr.bf16.mxu0 %v4462_v34  ;;  %v4472_v34 = vld [vmem:[#allocation13 + $0x110] ss:$8 sps:$4 sm:$0xff]  }
 0x2a4   : > { %3229 = vmatpush1.bf16.msra.mxu0 %v4460_v35  ;;  %v4477_v35 = vld [vmem:[#allocation13 + $0x124] ss:$8 sps:$4 sm:$0xff]  }
 0x2a5   : > { %3230 = vmatprep.subr.bf16.mxu0 %v4465_v36 }
 0x2a8   : > { %3231 = vmatpush1.bf16.msra.mxu0 %v4463_v37 }
 0x2a9   : > { %3232 = vmatprep.subr.bf16.mxu0 %v4468_v38  ;;  %v4478_v38 = vld [vmem:[#allocation13 + $0x130] ss:$8 sps:$4 sm:$0xff]  }
 0x2ac   : > { %3233 = vmatpush1.bf16.msra.mxu0 %v4466_v39  ;;  %v4483_v39 = vld [vmem:[#allocation13 + $0x144] ss:$8 sps:$4 sm:$0xff]  }
 0x2ad   : > { %3243 = vmatprep.subr.bf16.mxu0 %v4471_v40  ;;  %v4481_v40 = vld [vmem:[#allocation13 + $0x140] ss:$8 sps:$4 sm:$0xff]  }
 0x342   : > { %v2587_v47 = vpop.f32.mrb[4].mxu0  ;;  %v2751_v48 = vpop.f32.mrb[12].mxu1 }
 0x343   : > { %v3969_v51 = vadd.f32 %v2587_v47, %v1133_v43  ;;  %v2589_v52 = vpop.f32.mrb[5].mxu0  ;;  %v2753_v13 = vpop.f32.mrb[13].mxu1  ;;  %v5106_v1 = vadd.f32 %v2751_v48, %v1141_v27  ;;  %v4484_v43 = vld [vmem:[#allocation13 + $0x150] ss:$8 sps:$4 sm:$0xff]   ;;  %v4492_v47 = vld [vmem:[#allocation13 + $0x174] ss:$8 sps:$4 sm:$0xff]  }
 0x344   : > { %v3970_v54 = vadd.f32 %v2589_v52, %v1137_v44  ;;  %v3972_v55 = vadd.f32 %v2753_v13, %v1145_v45  ;;  %v2591_v56 = vpop.f32.mrb[6].mxu0  ;;  %v2755_v57 = vpop.f32.mrb[14].mxu1  ;;  %v4489_v44 = vld [vmem:[#allocation13 + $0x164] ss:$8 sps:$4 sm:$0xff]   ;;  %v4487_v45 = vld [vmem:[#allocation13 + $0x160] ss:$8 sps:$4 sm:$0xff]  }
 0x345   : > { %v2758_v20 = vmin.f32 %v3969_v51, 20.0  ;;  %v2592_v50 = vpop.f32.mrb[7].mxu0  ;;  %v2756_v59 = vpop.f32.mrb[15].mxu1  ;;  %vm2778_vm8 = vcmp.gt.f32.partialorder %v3969_v51, 20.0  ;;  %v2760_v36 = vmin.f32 %v5106_v1, 20.0  ;;  %vm2780_vm11 = vcmp.gt.f32.partialorder %v5106_v1, 20.0 }
 0x346   : > { %v2759_v60 = vmin.f32 %v3970_v54, 20.0  ;;  %v2761_v61 = vmin.f32 %v3972_v55, 20.0  ;;  %vm2779_vm9 = vcmp.gt.f32.partialorder %v3970_v54, 20.0  ;;  %vm2781_vm10 = vcmp.gt.f32.partialorder %v3972_v55, 20.0  ;;  %v4495_v13 = vld [vmem:[#allocation13 + $0x184] ss:$8 sps:$4 sm:$0xff]  }
 0x347   : > { %v2762_v62 = vmul.f32 1.442695, %v2758_v20  ;;  %v2766_v37 = vmul.f32 1.442695, %v2760_v36  ;;  %v4498_v56 = vld [vmem:[#allocation13 + $0x194] ss:$8 sps:$4 sm:$0xff]  }
 0x348   : > { %v2764_v63 = vmul.f32 1.442695, %v2759_v60  ;;  %v2768_v49 = vmul.f32 1.442695, %v2761_v61  ;;  %v4496_v57 = vld [vmem:[#allocation13 + $0x190] ss:$8 sps:$4 sm:$0xff]  }
 0x349   : > { %4565 = vpow2.f32 %v2762_v62  ;;  %v4501_v50 = vld [vmem:[#allocation13 + $0x1a4] ss:$8 sps:$4 sm:$0xff]   ;;  %v4499_v59 = vld [vmem:[#allocation13 + $0x1a0] ss:$8 sps:$4 sm:$0xff]   ;;  %v4504_v60 = vld [vmem:[#allocation13 + $0x1b4] ss:$8 sps:$4 sm:$0xff]  }
 0x34a   : > { %4567 = vpow2.f32 %v2764_v63  ;;  %v4502_v61 = vld [vmem:[#allocation13 + $0x1b0] ss:$8 sps:$4 sm:$0xff]   ;;  %v4507_v62 = vld [vmem:[#allocation13 + $0x1c4] ss:$8 sps:$4 sm:$0xff]   ;;  %v4505_v63 = vld [vmem:[#allocation13 + $0x1c0] ss:$8 sps:$4 sm:$0xff]  }
 0x34b   : > { %4569 = vpow2.f32 %v2768_v49  ;;  %v4510_v49 = vld [vmem:[#allocation13 + $0x1d4] ss:$8 sps:$4 sm:$0xff]  }
 0x34c   : > { %v4530_v27 = vld [vmem:[#allocation15 + $0x30] sm:$0xff]  }
 0x353   : > { %v4566_v41 = vpop.eup %4565 }
 0x354   : > { %v2770_v2 = vadd.f32 2.0, %v4566_v41  ;;  %v4568_v3 = vpop.eup %4567 }
 0x355   : > { %v4570_v4 = vpop.eup %4569  ;;  %v2771_v6 = vadd.f32 2.0, %v4568_v3 }
 0x356   : > { %v2774_v5 = vmul.f32 %v4566_v41, %v2770_v2  ;;  %v2773_v8 = vadd.f32 2.0, %v4570_v4  ;;  %v4508_v2 = vld [vmem:[#allocation13 + $0x1d0] ss:$8 sps:$4 sm:$0xff]  }
 0x357   : > { %v2775_v10 = vmul.f32 %v4568_v3, %v2771_v6  ;;  %v4513_v3 = vld [vmem:[#allocation13 + $0x1e4] ss:$8 sps:$4 sm:$0xff]   ;;  %v4516_v6 = vld [vmem:[#allocation13 + $0x1f4] ss:$8 sps:$4 sm:$0xff]  }
 0x358   : > { %v2782_v9 = vadd.f32 2.0, %v2774_v5  ;;  %v2777_v11 = vmul.f32 %v4570_v4, %v2773_v8 }
 0x359   : > { %v2783_v15 = vadd.f32 2.0, %v2775_v10 }
 0x35a   : > { %4571 = vrcp.f32 %v2782_v9  ;;  %v2785_v16 = vadd.f32 2.0, %v2777_v11  ;;  %v4514_v9 = vld [vmem:[#allocation13 + $0x1f0] ss:$8 sps:$4 sm:$0xff]  }
 0x35b   : > { %4573 = vrcp.f32 %v2783_v15  ;;  %v4517_v15 = vld [vmem:[#allocation15 + $0x40] sm:$0xff]  }
 0x35c   : > { %4575 = vrcp.f32 %v2785_v16  ;;  %v4518_v16 = vld [vmem:[#allocation15] sm:$0xff]   ;;  %3947 = vmatprep.subr.bf16.mxu1 %v4517_v15 }
 0x35d   : > { %4577 = vpow2.f32 %v2766_v37  ;;  %3948 = vmatpush3.bf16.msra.mxu1 %v4518_v16  ;;  %v3500_v16 = vld [vmem:[%s3499_s6] sm:$0xff] }
 0x364   : > { %v4572_v18 = vpop.eup %4571 }
 0x365   : > { %v2790_v58 = vmul.f32 %v4572_v18, %v2774_v5  ;;  %v4574_v19 = vpop.eup %4573  ;;  %v4511_v5 = vld [vmem:[#allocation13 + $0x1e0] ss:$8 sps:$4 sm:$0xff]  }
 0x366   : > { %v4576_v17 = vpop.eup %4575  ;;  %v2791_v21 = vmul.f32 %v4574_v19, %v2775_v10  ;;  %v4519_v18 = vld [vmem:[#allocation15 + $0x48] sm:$0xff]   ;;  %v4521_v19 = vld [vmem:[#allocation15 + $0x50] sm:$0xff]  }
 0x367   : > { %v2794_v22 = vmul.f32 %v3969_v51, %v2790_v58  ;;  %v2793_v23 = vmul.f32 %v4576_v17, %v2777_v11  ;;  %v4578_v48 = vpop.eup %4577  ;;  %v4520_v58 = vld [vmem:[#allocation15 + $0x8] sm:$0xff]   ;;  %3949 = vmatprep.subr.bf16.mxu1 %v4519_v18  ;;  %v4522_v17 = vld [vmem:[#allocation15 + $0x10] sm:$0xff]  }
 0x368   : > { %v2795_v24 = vmul.f32 %v3970_v54, %v2791_v21  ;;  %v2772_v52 = vadd.f32 2.0, %v4578_v48  ;;  %3950 = vmatpush3.bf16.msra.mxu1 %v4520_v58  ;;  %v4524_v21 = vld [vmem:[#allocation15 + $0x18] sm:$0xff]  }
 0x369   : > { %v2797_v25 = vmul.f32 %v3972_v55, %v2793_v23  ;;  %v2798_v31 = vsel %vm2778_vm8, %v3969_v51, %v2794_v22  ;;  %v4490_v51 = vld [vmem:[#allocation13 + $0x170] ss:$8 sps:$4 sm:$0xff]   ;;  %3951 = vmatprep.subr.bf16.mxu1 %v4521_v19  ;;  %v4525_v23 = vld [vmem:[#allocation15 + $0x60] sm:$0xff]  }
 0x36a   : > { %v2799_v26 = vsel %vm2779_vm9, %v3970_v54, %v2795_v24  ;;  %v2802_v53 = vpack.c.bf16 %v2798_v31, %v2798_v31  ;;  %v4493_v54 = vld [vmem:[#allocation13 + $0x180] ss:$8 sps:$4 sm:$0xff]   ;;  %v4523_v22 = vld [vmem:[#allocation15 + $0x58] sm:$0xff]  }
 0x36b   : > { %v2803_v28 = vpack.c.bf16 %v2799_v26, %v2799_v26  ;;  %v2801_v30 = vsel %vm2781_vm10, %v3972_v55, %v2797_v25  ;;  %v2776_v55 = vmul.f32 %v4578_v48, %v2772_v52  ;;  %v4526_v24 = vld [vmem:[#allocation15 + $0x20] sm:$0xff]   ;;  %v4527_v25 = vld [vmem:[#allocation15 + $0x68] sm:$0xff]   ;;  %v4529_v26 = vld [vmem:[#allocation15 + $0x70] sm:$0xff]  }
 0x36c   : > { %v2805_v33 = vpack.c.bf16 %v2801_v30, %v2801_v30  ;;  %3952 = vmatpush3.bf16.msra.mxu1 %v4522_v17  ;;  %v4528_v31 = vld [vmem:[#allocation15 + $0x28] sm:$0xff]  }
 0x36d   : > { %3234 = vmatprep.mubr.bf16.mxu0 %v2803_v28  ;;  %v2784_v20 = vadd.f32 2.0, %v2776_v55  ;;  %3953 = vmatprep.subr.bf16.mxu1 %v4523_v22  ;;  %v4531_v28 = vld [vmem:[#allocation15 + $0x78] sm:$0xff]   ;;  %v2870_v30 = vld [vmem:[%s5150_s9] sm:$0x3] }
 0x36e   : > { %3235 = vmatmul.mubr.bf16.vlgmr.msra.gmra.mrb[8].mxu0 %v2802_v53  ;;  %v2875_v53 = vrot.slane %v2870_v30, %v5025_v12 }
 0x36f   : > { %3244 = vmatpush1.bf16.msra.mxu0 %v4469_v29  ;;  %3275 = vmatprep.mubr.bf16.mxu0 %v2805_v33  ;;  %4579 = vrcp.f32 %v2784_v20  ;;  %v4532_v29 = vld [vmem:[#allocation15 + $0x38] sm:$0xff]  }
 0x370   : > { %3245 = vmatprep.subr.bf16.mxu0 %v4474_v32  ;;  %3954 = vmatpush3.bf16.msra.mxu1 %v4524_v21  ;;  %v2879_v32 = vrot.slane %v2870_v30, %v5030_v14 }
 0x371   : > { %3955 = vmatprep.subr.bf16.mxu1 %v4525_v23 }
 0x373   : > { %3246 = vmatpush1.bf16.msra.mxu0 %v4472_v34 }
 0x374   : > { %3247 = vmatprep.subr.bf16.mxu0 %v4477_v35  ;;  %3956 = vmatpush3.bf16.msra.mxu1 %v4526_v24 }
 0x375   : > { %3957 = vmatprep.subr.bf16.mxu1 %v4527_v25 }
 0x377   : > { %3248 = vmatpush1.bf16.msra.mxu0 %v4475_v7 }
 0x378   : > { %3249 = vmatprep.subr.bf16.mxu0 %v4480_v46  ;;  %3958 = vmatpush3.bf16.msra.mxu1 %v4528_v31 }
 0x379   : > { %v4580_v41 = vpop.eup %4579  ;;  %3959 = vmatprep.subr.bf16.mxu1 %v4529_v26 }
 0x37a   : > { %v2792_v4 = vmul.f32 %v4580_v41, %v2776_v55 }
 0x37b   : > { %3250 = vmatpush1.bf16.msra.mxu0 %v4478_v38 }
 0x37c   : > { %3251 = vmatprep.subr.bf16.mxu0 %v4483_v39  ;;  %v2796_v8 = vmul.f32 %v5106_v1, %v2792_v4  ;;  %3960 = vmatpush3.bf16.msra.mxu1 %v4530_v27  ;;  %v3494_v4 = vstv %s3484_s16 }
 0x37d   : > { %3961 = vmatprep.subr.bf16.mxu1 %v4531_v28 }
 0x37e   : > { %v2800_v10 = vsel %vm2780_vm11, %v5106_v1, %v2796_v8 }
 0x37f   : > { %3252 = vmatpush1.bf16.msra.mxu0 %v4481_v40  ;;  %v2804_v11 = vpack.c.bf16 %v2800_v10, %v2800_v10 }
 0x380   : > { %3253 = vmatprep.subr.bf16.mxu0 %v4486_v42  ;;  %3962 = vmatpush3.bf16.msra.mxu1 %v4532_v29 }
 0x383   : > { %3254 = vmatpush1.bf16.msra.mxu0 %v4484_v43 }
 0x384   : > { %3255 = vmatprep.subr.bf16.mxu0 %v4489_v44 }
 0x387   : > { %3256 = vmatpush1.bf16.msra.mxu0 %v4487_v45 }
 0x388   : > { %3257 = vmatprep.subr.bf16.mxu0 %v4492_v47 }
 0x38b   : > { %3258 = vmatpush1.bf16.msra.mxu0 %v4490_v51 }
 0x38c   : > { %3259 = vmatprep.subr.bf16.mxu0 %v4495_v13 }
 0x38f   : > { %3260 = vmatpush1.bf16.msra.mxu0 %v4493_v54 }
 0x390   : > { %3261 = vmatprep.subr.bf16.mxu0 %v4498_v56 }
 0x393   : > { %3262 = vmatpush1.bf16.msra.mxu0 %v4496_v57 }
 0x394   : > { %3263 = vmatprep.subr.bf16.mxu0 %v4501_v50 }
 0x397   : > { %3264 = vmatpush1.bf16.msra.mxu0 %v4499_v59 }
 0x398   : > { %3265 = vmatprep.subr.bf16.mxu0 %v4504_v60  ;;  %v3926_v60 = vld [vmem:[%s5152_s11] ss:$0 sm:$0xff] }
 0x39b   : > { %3266 = vmatpush1.bf16.msra.mxu0 %v4502_v61 }
 0x39c   : > { %3267 = vmatprep.subr.bf16.mxu0 %v4507_v62 }
 0x39f   : > { %3268 = vmatpush1.bf16.msra.mxu0 %v4505_v63 }
 0x3a0   : > { %3269 = vmatprep.subr.bf16.mxu0 %v4510_v49  ;;  %v3491_v49 = vstv %s3486_s13 }
 0x3a3   : > { %3270 = vmatpush1.bf16.msra.mxu0 %v4508_v2 }
 0x3a4   : > { %3271 = vmatprep.subr.bf16.mxu0 %v4513_v3 }
 0x3a7   : > { %3272 = vmatpush1.bf16.msra.mxu0 %v4511_v5 }
 0x3a8   : > { %3273 = vmatprep.subr.bf16.mxu0 %v4516_v6  ;;  %v3503_v6 = vstv %s3490_s30 }
 0x3ab   : > { %3274 = vmatpush1.bf16.msra.mxu0 %v4514_v9  ;;  %v3501_v9 = vstv %s3488_s1 }
 0x3ae   : > { %3276 = vmatmul.mubr.bf16.vlgmr.msra.gmra.mrb[8].mxu0 %v2804_v11  ;;  %v3504_v11 = vmul.f32 %v4797_v0, %v3503_v6 }
 0x481   : > { %v3277_v33 = vpop.f32.mrb[8].mxu0 }
 0x482   : > { %v3973_v1 = vadd.f32 %v3277_v33, %v2875_v53  ;;  %v3279_v34 = vpop.f32.mrb[9].mxu0 }
 0x483   : > { %v3974_v35 = vadd.f32 %v3279_v34, %v2879_v32  ;;  %v3281_v36 = vpop.f32.mrb[10].mxu0 }
 0x484   : > { %v3284_v7 = vmin.f32 %v3973_v1, 20.0  ;;  %v3282_v46 = vpop.f32.mrb[11].mxu0  ;;  %vm3294_vm12 = vcmp.gt.f32.partialorder %v3973_v1, 20.0 }
 0x485   : > { %v3285_v37 = vmin.f32 %v3974_v35, 20.0  ;;  %vm3295_vm13 = vcmp.gt.f32.partialorder %v3974_v35, 20.0 }
 0x486   : > { %v3286_v38 = vmul.f32 1.442695, %v3284_v7 }
 0x487   : > { %v3288_v39 = vmul.f32 1.442695, %v3285_v37 }
 0x488   : > { %4581 = vpow2.f32 %v3286_v38 }
 0x489   : > { %4583 = vpow2.f32 %v3288_v39 }
 0x492   : > { %v4582_v40 = vpop.eup %4581 }
 0x493   : > { %v4584_v42 = vpop.eup %4583  ;;  %v3290_v43 = vadd.f32 2.0, %v4582_v40 }
 0x494   : > { %v3291_v44 = vadd.f32 2.0, %v4584_v42 }
 0x495   : > { %v3292_v45 = vmul.f32 %v4582_v40, %v3290_v43 }
 0x496   : > { %v3293_v12 = vmul.f32 %v4584_v42, %v3291_v44 }
 0x497   : > { %v3296_v47 = vadd.f32 2.0, %v3292_v45 }
 0x498   : > { %v3297_v14 = vadd.f32 2.0, %v3293_v12 }
 0x499   : > { %4585 = vrcp.f32 %v3296_v47 }
 0x49a   : > { %4587 = vrcp.f32 %v3297_v14 }
 0x4a3   : > { %v4586_v48 = vpop.eup %4585 }
 0x4a4   : > { %v4588_v51 = vpop.eup %4587  ;;  %v3300_v52 = vmul.f32 %v4586_v48, %v3292_v45 }
 0x4a5   : > { %v3301_v13 = vmul.f32 %v4588_v51, %v3293_v12 }
 0x4a6   : > { %v3302_v54 = vmul.f32 %v3973_v1, %v3300_v52 }
 0x4a7   : > { %v3303_v55 = vmul.f32 %v3974_v35, %v3301_v13 }
 0x4a8   : > { %v3304_v56 = vsel %vm3294_vm12, %v3973_v1, %v3302_v54 }
 0x4a9   : > { %v3305_v57 = vsel %vm3295_vm13, %v3974_v35, %v3303_v55  ;;  %v3306_v50 = vpack.c.bf16 %v3304_v56, %v3304_v56 }
 0x4aa   : > { %v3307_v20 = vpack.c.bf16 %v3305_v57, %v3305_v57 }
 0x4ac   : > { %3475 = vmatprep.mubr.bf16.mxu1 %v3307_v20 }
 0x4ad   : > { %3476 = vmatmul.mubr.bf16.vlgmr.msra.gmra.mrb[16].mxu1 %v3306_v50 }
 0x580   : > { %v3963_v59 = vpop.f32.mrb[16].mxu1 }
 0x581   : > { %v3964_v61 = vpop.f32.mrb[17].mxu1 }
 0x582   : > { %v3965_v62 = vadd.f32 %v3964_v61, %v3963_v59  ;;  %v3966_v63 = vpop.f32.mrb[18].mxu1 }
 0x583   : > { %v3967_v41 = vpop.f32.mrb[19].mxu1 }
 0x584   : > { %v3478_v2 = vadd.f32 %v3965_v62, %v3926_v60 }
 0x586   : > { %v3492_v3 = vmul.f32 %v3491_v49, %v3478_v2 }
 0x588   : > { %v3493_v5 = vsub.f32 %v4797_v0, %v3492_v3 }
 0x58a   : > { %v3495_v8 = vmul.f32 %v3494_v4, %v3493_v5 }
 0x58c   : > { %v3944_v10 = vclamps-f32 %v3495_v8, 1.0 }
 0x58e   : > { %v3502_v15 = vmul.f32 %v3944_v10, %v3501_v9  ;;  %150 = sbr.rel (!%p148_p3) target bundleno = 140 (0x8c), region = 109 }
 0x590   : > { %v3505_v18 = vadd.f32 %v3504_v11, %v3502_v15 }
 0x592   : > { %v3506_v58 = vadd.f32 %v3505_v18, %v3500_v16  }
 0x594   : > { %v5154_v0 = vmov %v3506_v58  ;;  %3507 = vst [vmem:[#allocation16] sm:$0xff] (%p148_p3), %v3506_v58 }
 0x595   :  { %4764 = shalt.err (!%p4761_p8)
}
 0x596   :  { %s4765_s3 = scalar_lea.hbm %s5153_s12, 128 }
 0x597   :  { %p4766_p9 = scmp.ne.s32.totalorder %s5153_s12, %s4765_s3  ;;  %p4769_p10 = scmp.lt.u32.totalorder %s4765_s3, %s5153_s12 }
 0x599   :  { %p4771_p11 = pnand %p4769_p10, %p4766_p9 }
 0x59b   :  { %4774 = shalt.err (!%p4771_p11)
}
 0x59c   :  { %3517 = dma.vmem_to_hbm [thread:$0]  %s3515_s19, 128, %s5153_s12, [#allocation4]  }
 0x59d   :  { %4793 = dma.done.wait [#allocation4], 128  }
 0x59e   :  { %4794 = vsyncadd [#allocation4], 4294967168 }
 0x59f   :  { %3521 = vsyncpa [#allocation3], 1 }
 0x5a0   :  { %3522 = vsyncpa [#allocation8], 1 }
 0x5a1   :  { %3523 = vsyncpa [#allocation11], 1 }
 0x5a2   :  { %3524 = vsyncpa [#allocation14], 1 }
 0x5a3   :  { %3525 = vsyncpa [#allocation4], 1 }
 0x5a4   :  { %3526 = vsyncpa [#allocation5], 1 }

</bundles_post_ra>
